<compile_context>
chip_gen: v5e
topology: v5e:2x2
jax: 0.10.0
libtpu: 0.0.40
codegen_flags: <defaults>
</compile_context>

<pallas_src>
import math
import functools

import jax
import jax.numpy as jnp
import numpy as np
from jax import lax
from jax.experimental import pallas as pl
from jax.experimental.pallas import tpu as pltpu


# ----------------------------------------------------------------------------
# Fused kernel: hoisted input projection -> serial GRU recurrence ->
# hoisted output Linear + tanh.  Runs in a single grid step.
# ----------------------------------------------------------------------------
def _gru_gen_kernel(S, Bp, Hp,
                    x_ref, n_ref, wx_ref, wn_ref, whh_ref,
                    bgi_ref, bhhn_ref, wmap_ref, bmap_ref, h0_ref,
                    y_ref, hT_ref,
                    gi_scr, h_scr):
    # (1) Hoisted input projection for ALL timesteps (split-weight form; no
    #     concat of x/noise materialized anywhere).  bgi already has b_hh
    #     folded in for the r/z gates.
    gi_scr[...] = (
        jnp.dot(x_ref[...], wx_ref[...], preferred_element_type=jnp.float32)
        + jnp.dot(n_ref[...], wn_ref[...], preferred_element_type=jnp.float32)
        + bgi_ref[...])

    # Loop-invariants hoisted out of the unrolled recurrence (JAX does not CSE
    # broadcast_in_dim; with unroll=True it would emit S copies otherwise).
    whh = whh_ref[...]                                     # (Hp, 3*Hp)
    bhh_n = jnp.broadcast_to(bhhn_ref[...], (Bp, Hp))      # one broadcast total

    # (2) Serial recurrence over time, fully inside this kernel invocation.
    def step(t, h):
        row = pl.multiple_of(t * Bp, Bp)                   # sublane-aligned
        gi = gi_scr[pl.ds(row, Bp), :]                     # (Bp, 3*Hp) clean tiles
        gh = jnp.dot(h, whh, preferred_element_type=jnp.float32)  # (Bp, 3*Hp)

        # Fused r/z sigmoid: gates r,z occupy the first 2*Hp (lane-aligned,
        # contiguous) columns -> one EUP push instead of two per step.
        rz = jax.nn.sigmoid(gi[:, :2 * Hp] + gh[:, :2 * Hp])
        r = rz[:, :Hp]
        z = rz[:, Hp:2 * Hp]
        n = jnp.tanh(gi[:, 2 * Hp:] + r * (gh[:, 2 * Hp:] + bhh_n))
        # (1-z)*n + z*h  ==  n + z*(h-n): one fewer VPU op on the serial chain.
        h_new = n + z * (h - n)

        h_scr[pl.ds(row, Bp), :] = h_new                   # aligned whole-tile store
        return h_new

    unroll = True if S <= 16 else 4                        # cap unroll if S grows
    hT = lax.fori_loop(0, S, step, h0_ref[...], unroll=unroll)
    hT_ref[...] = hT

    # (3) Hoisted output Linear + tanh over all timesteps at once (single
    #     store of the full y slab).
    y_ref[...] = jnp.tanh(
        jnp.dot(h_scr[...], wmap_ref[...], preferred_element_type=jnp.float32)
        + bmap_ref[...])


# ----------------------------------------------------------------------------
# Wrapper: lane/sublane-aligned packing + pallas_call
# ----------------------------------------------------------------------------
def _pad_gate_cols(w, H, Hp):
    """(rows, 3H) -> (rows, 3*Hp) with gate g placed at lanes [g*Hp, g*Hp+H)."""
    rows = w.shape[0]
    out = jnp.zeros((rows, 3 * Hp), jnp.float32)
    for g in range(3):
        out = out.at[:, g * Hp:g * Hp + H].set(w[:, g * H:(g + 1) * H])
    return out


def generator_forward_pallas(x, noise, params, h0):
    """x: (B, S, input_size) f32; noise: (B, S, noise_size) f32; h0: (B, H) f32."""
    B, S, I = x.shape
    N = noise.shape[-1]
    H = h0.shape[-1]

    Bp = max(8, ((B + 7) // 8) * 8)            # pad batch to sublane granularity
    Hp = max(128, ((H + 127) // 128) * 128)    # pad each gate block to lane width

    def pack_seq(a, F):
        a = jnp.transpose(a, (1, 0, 2))                    # seq-major (S, B, F)
        a = jnp.pad(a, ((0, 0), (0, Bp - B), (0, 0)))      # (S, Bp, F)
        return a.reshape(S * Bp, F)

    xs = pack_seq(x, I)
    ns = pack_seq(noise, N)

    # Gate-padded, transposed weights (zero padding keeps numerics exact).
    wih_t = _pad_gate_cols(params["w_ih"].T, H, Hp)        # (I+N, 3*Hp)
    wx_t = wih_t[:I]                                       # (I, 3*Hp)
    wn_t = wih_t[I:]                                       # (N, 3*Hp)
    whh_t = jnp.zeros((Hp, 3 * Hp), jnp.float32).at[:H, :].set(
        _pad_gate_cols(params["w_hh"].T, H, Hp))           # (Hp, 3*Hp)

    b_ih, b_hh = params["b_ih"], params["b_hh"]
    # Pre-sum r/z biases (b_ih + b_hh); b_hh_n must stay separate (scaled by r).
    bgi = jnp.zeros((1, 3 * Hp), jnp.float32)
    bgi = bgi.at[0, 0 * Hp:0 * Hp + H].set(b_ih[0:H] + b_hh[0:H])
    bgi = bgi.at[0, 1 * Hp:1 * Hp + H].set(b_ih[H:2 * H] + b_hh[H:2 * H])
    bgi = bgi.at[0, 2 * Hp:2 * Hp + H].set(b_ih[2 * H:3 * H])
    bhh_n = jnp.zeros((1, Hp), jnp.float32).at[0, :H].set(b_hh[2 * H:3 * H])

    wmap_t = jnp.zeros((Hp, I), jnp.float32).at[:H, :].set(params["w_map"].T)
    bmap = params["b_map"].reshape(1, I)
    h0p = jnp.zeros((Bp, Hp), jnp.float32).at[:B, :H].set(h0)

    kernel = functools.partial(_gru_gen_kernel, S, Bp, Hp)

    y_flat, hT_p = pl.pallas_call(
        kernel,
        out_shape=(jax.ShapeDtypeStruct((S * Bp, I), jnp.float32),
                   jax.ShapeDtypeStruct((Bp, Hp), jnp.float32)),
        grid_spec=pltpu.PrefetchScalarGridSpec(
            num_scalar_prefetch=0,
            grid=(1,),                                     # whole sequence in one step
            in_specs=[
                pl.BlockSpec((S * Bp, I), lambda i: (0, 0)),     # x  (all timesteps)
                pl.BlockSpec((S * Bp, N), lambda i: (0, 0)),     # noise
                pl.BlockSpec((I, 3 * Hp), lambda i: (0, 0)),     # W_x^T  (gate-padded)
                pl.BlockSpec((N, 3 * Hp), lambda i: (0, 0)),     # W_n^T
                pl.BlockSpec((Hp, 3 * Hp), lambda i: (0, 0)),    # W_hh^T
                pl.BlockSpec((1, 3 * Hp), lambda i: (0, 0)),     # fused gi bias
                pl.BlockSpec((1, Hp), lambda i: (0, 0)),         # b_hh (n gate)
                pl.BlockSpec((Hp, I), lambda i: (0, 0)),         # W_map^T
                pl.BlockSpec((1, I), lambda i: (0, 0)),          # b_map
                pl.BlockSpec((Bp, Hp), lambda i: (0, 0)),        # h0 (padded)
            ],
            out_specs=[
                pl.BlockSpec((S * Bp, I), lambda i: (0, 0)),     # y (all timesteps)
                pl.BlockSpec((Bp, Hp), lambda i: (0, 0)),        # final hidden state
            ],
            scratch_shapes=[
                pltpu.VMEM((S * Bp, 3 * Hp), jnp.float32),       # hoisted gi, all t
                pltpu.VMEM((S * Bp, Hp), jnp.float32),           # all hidden states
            ],
        ),
        compiler_params=pltpu.CompilerParams(
            dimension_semantics=("arbitrary",)),           # recurrence => sequential
    )(xs, ns, wx_t, wn_t, whh_t, bgi, bhh_n, wmap_t, bmap, h0p)

    y = jnp.transpose(y_flat.reshape(S, Bp, I)[:, :B, :], (1, 0, 2))   # (B, S, I)
    hT = hT_p[:B, :H]
    return y, hT


# ----------------------------------------------------------------------------
# Pure-JAX reference (for correctness check only)
# ----------------------------------------------------------------------------
def generator_forward_ref(x, noise, params, h0):
    xc = jnp.concatenate([x, noise], axis=2)
    w_ih, w_hh, b_ih, b_hh = params["w_ih"], params["w_hh"], params["b_ih"], params["b_hh"]

    def step(h, x_t):
        gi = x_t @ w_ih.T + b_ih
        gh = h @ w_hh.T + b_hh
        i_r, i_z, i_n = jnp.split(gi, 3, axis=-1)
        h_r, h_z, h_n = jnp.split(gh, 3, axis=-1)
        r = jax.nn.sigmoid(i_r + h_r)
        z = jax.nn.sigmoid(i_z + h_z)
        n = jnp.tanh(i_n + r * h_n)
        h_new = (1.0 - z) * n + z * h
        return h_new, h_new

    hT, hs = jax.lax.scan(step, h0, jnp.transpose(xc, (1, 0, 2)))
    hs = jnp.transpose(hs, (1, 0, 2))                      # (B, S, H)
    y = hs @ params["w_map"].T + params["b_map"]
    return jnp.tanh(y), hT


# ----------------------------------------------------------------------------
# Deterministic parameter init (mirrors torch.nn.GRU / nn.Linear init ranges)
# ----------------------------------------------------------------------------
def init_params(key, input_size, noise_size, hidden_size):
    D = input_size + noise_size
    k = 1.0 / math.sqrt(hidden_size)
    ks = jax.random.split(key, 6)
    u = lambda kk, shape: jax.random.uniform(kk, shape, jnp.float32, -k, k)
    return {
        "w_ih": u(ks[0], (3 * hidden_size, D)),
        "w_hh": u(ks[1], (3 * hidden_size, hidden_size)),
        "b_ih": u(ks[2], (3 * hidden_size,)),
        "b_hh": u(ks[3], (3 * hidden_size,)),
        "w_map": u(ks[4], (input_size, hidden_size)),
        "b_map": u(ks[5], (input_size,)),
    }


if __name__ == "__main__":
    # Small shapes consistent with the module's forward.
    batch_size = 2
    sequence_length = 8
    input_size = 4
    noise_size = 4
    hidden_size = 32

    root = jax.random.PRNGKey(0)
    k_par, k_x, k_noise = jax.random.split(root, 3)

    params = init_params(k_par, input_size, noise_size, hidden_size)
    x = jax.random.normal(k_x, (batch_size, sequence_length, input_size), jnp.float32)
    # noise_input=False path: fresh gaussian noise concatenated to x each forward
    # (generated with jax.random for determinism, equivalent to torch.randn).
    noise = jax.random.normal(k_noise, (batch_size, sequence_length, noise_size), jnp.float32)
    h0 = jnp.zeros((batch_size, hidden_size), jnp.float32)  # init_hidden_state()

    y, hT = generator_forward_pallas(x, noise, params, h0)
    jax.block_until_ready((y, hT))

    y_ref, hT_ref = generator_forward_ref(x, noise, params, h0)
    assert y.shape == (batch_size, sequence_length, input_size)
    assert hT.shape == (batch_size, hidden_size)
    np.testing.assert_allclose(np.asarray(y), np.asarray(y_ref), rtol=1e-5, atol=1e-5)
    np.testing.assert_allclose(np.asarray(hT), np.asarray(hT_ref), rtol=1e-5, atol=1e-5)

    print("KERNEL_OK")
</pallas_src>

<mosaic_0001>
module attributes {stable_mosaic.version = 11 : i64} {
  func.func @_gru_gen_kernel(%arg0: i32, %arg1: memref<64x4xf32, #tpu.memory_space<vmem>>, %arg2: memref<64x4xf32, #tpu.memory_space<vmem>>, %arg3: memref<4x384xf32, #tpu.memory_space<vmem>>, %arg4: memref<4x384xf32, #tpu.memory_space<vmem>>, %arg5: memref<128x384xf32, #tpu.memory_space<vmem>>, %arg6: memref<1x384xf32, #tpu.memory_space<vmem>>, %arg7: memref<1x128xf32, #tpu.memory_space<vmem>>, %arg8: memref<128x4xf32, #tpu.memory_space<vmem>>, %arg9: memref<1x4xf32, #tpu.memory_space<vmem>>, %arg10: memref<8x128xf32, #tpu.memory_space<vmem>>, %arg11: memref<64x4xf32, #tpu.memory_space<vmem>>, %arg12: memref<8x128xf32, #tpu.memory_space<vmem>>, %arg13: memref<64x384xf32, #tpu.memory_space<vmem>>, %arg14: memref<64x128xf32, #tpu.memory_space<vmem>>) attributes {dimension_semantics = [#tpu.dimension_semantics<arbitrary>], iteration_bounds = array<i64: 1>, scalar_prefetch = 0 : i64, scratch_operands = 2 : i64, tpu.core_type = #tpu.core_type<tc>, window_params = [{pipeline_mode = #tpu.pipeline_mode<synchronous>, transform_indices = @transform_0, window_bounds = array<i64: 64, 4>}, {pipeline_mode = #tpu.pipeline_mode<synchronous>, transform_indices = @transform_1, window_bounds = array<i64: 64, 4>}, {pipeline_mode = #tpu.pipeline_mode<synchronous>, transform_indices = @transform_2, window_bounds = array<i64: 4, 384>}, {pipeline_mode = #tpu.pipeline_mode<synchronous>, transform_indices = @transform_3, window_bounds = array<i64: 4, 384>}, {pipeline_mode = #tpu.pipeline_mode<synchronous>, transform_indices = @transform_4, window_bounds = array<i64: 128, 384>}, {pipeline_mode = #tpu.pipeline_mode<synchronous>, transform_indices = @transform_5, window_bounds = array<i64: 1, 384>}, {pipeline_mode = #tpu.pipeline_mode<synchronous>, transform_indices = @transform_6, window_bounds = array<i64: 1, 128>}, {pipeline_mode = #tpu.pipeline_mode<synchronous>, transform_indices = @transform_7, window_bounds = array<i64: 128, 4>}, {pipeline_mode = #tpu.pipeline_mode<synchronous>, transform_indices = @transform_8, window_bounds = array<i64: 1, 4>}, {pipeline_mode = #tpu.pipeline_mode<synchronous>, transform_indices = @transform_9, window_bounds = array<i64: 8, 128>}, {pipeline_mode = #tpu.pipeline_mode<synchronous>, transform_indices = @transform_10, window_bounds = array<i64: 64, 4>}, {pipeline_mode = #tpu.pipeline_mode<synchronous>, transform_indices = @transform_11, window_bounds = array<i64: 8, 128>}]} {
    %c0 = arith.constant 0 : index
    %c0_0 = arith.constant 0 : index
    %0 = vector.load %arg1[%c0, %c0_0] : memref<64x4xf32, #tpu.memory_space<vmem>>, vector<64x4xf32>
    %c0_1 = arith.constant 0 : index
    %c0_2 = arith.constant 0 : index
    %1 = vector.load %arg3[%c0_1, %c0_2] : memref<4x384xf32, #tpu.memory_space<vmem>>, vector<4x384xf32>
    %cst = arith.constant dense<0.000000e+00> : vector<64x384xf32>
    %2 = tpu.matmul %0, %1, %cst {dimension_numbers = #tpu.dot_dimension_numbers<[1], [0], [0], [1], [0, 0, 1, 1], [], []>} : vector<64x4xf32>, vector<4x384xf32>, vector<64x384xf32> -> vector<64x384xf32>
    %c0_3 = arith.constant 0 : index
    %c0_4 = arith.constant 0 : index
    %3 = vector.load %arg2[%c0_3, %c0_4] : memref<64x4xf32, #tpu.memory_space<vmem>>, vector<64x4xf32>
    %c0_5 = arith.constant 0 : index
    %c0_6 = arith.constant 0 : index
    %4 = vector.load %arg4[%c0_5, %c0_6] : memref<4x384xf32, #tpu.memory_space<vmem>>, vector<4x384xf32>
    %cst_7 = arith.constant dense<0.000000e+00> : vector<64x384xf32>
    %5 = tpu.matmul %3, %4, %cst_7 {dimension_numbers = #tpu.dot_dimension_numbers<[1], [0], [0], [1], [0, 0, 1, 1], [], []>} : vector<64x4xf32>, vector<4x384xf32>, vector<64x384xf32> -> vector<64x384xf32>
    %6 = arith.addf %2, %5 : vector<64x384xf32>
    %c0_8 = arith.constant 0 : index
    %c0_9 = arith.constant 0 : index
    %7 = vector.load %arg6[%c0_8, %c0_9] : memref<1x384xf32, #tpu.memory_space<vmem>>, vector<1x384xf32>
    %8 = vector.broadcast %7 : vector<1x384xf32> to vector<64x384xf32>
    %9 = arith.addf %6, %8 : vector<64x384xf32>
    %c0_10 = arith.constant 0 : index
    %c0_11 = arith.constant 0 : index
    %10 = vector.load %arg13[%c0_10, %c0_11] : memref<64x384xf32, #tpu.memory_space<vmem>>, vector<64x384xf32>
    tpu.vector_store %arg13[%c0_10, %c0_11], %9 {strides = array<i32>} : memref<64x384xf32, #tpu.memory_space<vmem>>, vector<64x384xf32>,
    %c0_12 = arith.constant 0 : index
    %c0_13 = arith.constant 0 : index
    %11 = vector.load %arg5[%c0_12, %c0_13] : memref<128x384xf32, #tpu.memory_space<vmem>>, vector<128x384xf32>
    %c0_14 = arith.constant 0 : index
    %c0_15 = arith.constant 0 : index
    %12 = vector.load %arg7[%c0_14, %c0_15] : memref<1x128xf32, #tpu.memory_space<vmem>>, vector<1x128xf32>
    %13 = vector.shape_cast %12 : vector<1x128xf32> to vector<1x128xf32>
    %14 = vector.broadcast %13 : vector<1x128xf32> to vector<8x128xf32>
    %c0_16 = arith.constant 0 : index
    %c0_17 = arith.constant 0 : index
    %15 = vector.load %arg10[%c0_16, %c0_17] : memref<8x128xf32, #tpu.memory_space<vmem>>, vector<8x128xf32>
    %c0_i32 = arith.constant 0 : i32
    %c8_i32 = arith.constant 8 : i32
    %16 = arith.muli %c0_i32, %c8_i32 : i32
    %17 = tpu.assume_multiple %16, 8 : i32
    %18 = arith.index_cast %17 : i32 to index
    %c0_18 = arith.constant 0 : index
    %19 = vector.load %arg13[%18, %c0_18] : memref<64x384xf32, #tpu.memory_space<vmem>>, vector<8x384xf32>
    %cst_19 = arith.constant dense<0.000000e+00> : vector<8x384xf32>
    %20 = tpu.matmul %15, %11, %cst_19 {dimension_numbers = #tpu.dot_dimension_numbers<[1], [0], [0], [1], [0, 0, 1, 1], [], []>} : vector<8x128xf32>, vector<128x384xf32>, vector<8x384xf32> -> vector<8x384xf32>
    %21 = vector.extract_strided_slice %19 {offsets = [0, 0], sizes = [8, 256], strides = [1, 1]} : vector<8x384xf32> to vector<8x256xf32>
    %22 = vector.extract_strided_slice %20 {offsets = [0, 0], sizes = [8, 256], strides = [1, 1]} : vector<8x384xf32> to vector<8x256xf32>
    %23 = arith.addf %21, %22 : vector<8x256xf32>
    %24 = arith.negf %23 : vector<8x256xf32>
    %25 = math.exp %24 : vector<8x256xf32>
    %cst_20 = arith.constant 1.000000e+00 : f32
    %26 = vector.broadcast %cst_20 : f32 to vector<8x256xf32>
    %27 = arith.addf %26, %25 : vector<8x256xf32>
    %28 = arith.divf %26, %27 : vector<8x256xf32>
    %29 = vector.extract_strided_slice %28 {offsets = [0, 0], sizes = [8, 128], strides = [1, 1]} : vector<8x256xf32> to vector<8x128xf32>
    %30 = vector.extract_strided_slice %28 {offsets = [0, 128], sizes = [8, 128], strides = [1, 1]} : vector<8x256xf32> to vector<8x128xf32>
    %31 = vector.extract_strided_slice %19 {offsets = [0, 256], sizes = [8, 128], strides = [1, 1]} : vector<8x384xf32> to vector<8x128xf32>
    %32 = vector.extract_strided_slice %20 {offsets = [0, 256], sizes = [8, 128], strides = [1, 1]} : vector<8x384xf32> to vector<8x128xf32>
    %33 = arith.addf %32, %14 : vector<8x128xf32>
    %34 = arith.mulf %29, %33 : vector<8x128xf32>
    %35 = arith.addf %31, %34 : vector<8x128xf32>
    %36 = math.tanh %35 : vector<8x128xf32>
    %37 = arith.subf %15, %36 : vector<8x128xf32>
    %38 = arith.mulf %30, %37 : vector<8x128xf32>
    %39 = arith.addf %36, %38 : vector<8x128xf32>
    %40 = arith.index_cast %17 : i32 to index
    %c0_21 = arith.constant 0 : index
    %41 = vector.load %arg14[%40, %c0_21] : memref<64x128xf32, #tpu.memory_space<vmem>>, vector<8x128xf32>
    tpu.vector_store %arg14[%40, %c0_21], %39 {strides = array<i32>} : memref<64x128xf32, #tpu.memory_space<vmem>>, vector<8x128xf32>,
    %c1_i32 = arith.constant 1 : i32
    %c8_i32_22 = arith.constant 8 : i32
    %42 = arith.muli %c1_i32, %c8_i32_22 : i32
    %43 = tpu.assume_multiple %42, 8 : i32
    %44 = arith.index_cast %43 : i32 to index
    %c0_23 = arith.constant 0 : index
    %45 = vector.load %arg13[%44, %c0_23] : memref<64x384xf32, #tpu.memory_space<vmem>>, vector<8x384xf32>
    %cst_24 = arith.constant dense<0.000000e+00> : vector<8x384xf32>
    %46 = tpu.matmul %39, %11, %cst_24 {dimension_numbers = #tpu.dot_dimension_numbers<[1], [0], [0], [1], [0, 0, 1, 1], [], []>} : vector<8x128xf32>, vector<128x384xf32>, vector<8x384xf32> -> vector<8x384xf32>
    %47 = vector.extract_strided_slice %45 {offsets = [0, 0], sizes = [8, 256], strides = [1, 1]} : vector<8x384xf32> to vector<8x256xf32>
    %48 = vector.extract_strided_slice %46 {offsets = [0, 0], sizes = [8, 256], strides = [1, 1]} : vector<8x384xf32> to vector<8x256xf32>
    %49 = arith.addf %47, %48 : vector<8x256xf32>
    %50 = arith.negf %49 : vector<8x256xf32>
    %51 = math.exp %50 : vector<8x256xf32>
    %cst_25 = arith.constant 1.000000e+00 : f32
    %52 = vector.broadcast %cst_25 : f32 to vector<8x256xf32>
    %53 = arith.addf %52, %51 : vector<8x256xf32>
    %54 = arith.divf %52, %53 : vector<8x256xf32>
    %55 = vector.extract_strided_slice %54 {offsets = [0, 0], sizes = [8, 128], strides = [1, 1]} : vector<8x256xf32> to vector<8x128xf32>
    %56 = vector.extract_strided_slice %54 {offsets = [0, 128], sizes = [8, 128], strides = [1, 1]} : vector<8x256xf32> to vector<8x128xf32>
    %57 = vector.extract_strided_slice %45 {offsets = [0, 256], sizes = [8, 128], strides = [1, 1]} : vector<8x384xf32> to vector<8x128xf32>
    %58 = vector.extract_strided_slice %46 {offsets = [0, 256], sizes = [8, 128], strides = [1, 1]} : vector<8x384xf32> to vector<8x128xf32>
    %59 = arith.addf %58, %14 : vector<8x128xf32>
    %60 = arith.mulf %55, %59 : vector<8x128xf32>
    %61 = arith.addf %57, %60 : vector<8x128xf32>
    %62 = math.tanh %61 : vector<8x128xf32>
    %63 = arith.subf %39, %62 : vector<8x128xf32>
    %64 = arith.mulf %56, %63 : vector<8x128xf32>
    %65 = arith.addf %62, %64 : vector<8x128xf32>
    %66 = arith.index_cast %43 : i32 to index
    %c0_26 = arith.constant 0 : index
    %67 = vector.load %arg14[%66, %c0_26] : memref<64x128xf32, #tpu.memory_space<vmem>>, vector<8x128xf32>
    tpu.vector_store %arg14[%66, %c0_26], %65 {strides = array<i32>} : memref<64x128xf32, #tpu.memory_space<vmem>>, vector<8x128xf32>,
    %c2_i32 = arith.constant 2 : i32
    %c8_i32_27 = arith.constant 8 : i32
    %68 = arith.muli %c2_i32, %c8_i32_27 : i32
    %69 = tpu.assume_multiple %68, 8 : i32
    %70 = arith.index_cast %69 : i32 to index
    %c0_28 = arith.constant 0 : index
    %71 = vector.load %arg13[%70, %c0_28] : memref<64x384xf32, #tpu.memory_space<vmem>>, vector<8x384xf32>
    %cst_29 = arith.constant dense<0.000000e+00> : vector<8x384xf32>
    %72 = tpu.matmul %65, %11, %cst_29 {dimension_numbers = #tpu.dot_dimension_numbers<[1], [0], [0], [1], [0, 0, 1, 1], [], []>} : vector<8x128xf32>, vector<128x384xf32>, vector<8x384xf32> -> vector<8x384xf32>
    %73 = vector.extract_strided_slice %71 {offsets = [0, 0], sizes = [8, 256], strides = [1, 1]} : vector<8x384xf32> to vector<8x256xf32>
    %74 = vector.extract_strided_slice %72 {offsets = [0, 0], sizes = [8, 256], strides = [1, 1]} : vector<8x384xf32> to vector<8x256xf32>
    %75 = arith.addf %73, %74 : vector<8x256xf32>
    %76 = arith.negf %75 : vector<8x256xf32>
    %77 = math.exp %76 : vector<8x256xf32>
    %cst_30 = arith.constant 1.000000e+00 : f32
    %78 = vector.broadcast %cst_30 : f32 to vector<8x256xf32>
    %79 = arith.addf %78, %77 : vector<8x256xf32>
    %80 = arith.divf %78, %79 : vector<8x256xf32>
    %81 = vector.extract_strided_slice %80 {offsets = [0, 0], sizes = [8, 128], strides = [1, 1]} : vector<8x256xf32> to vector<8x128xf32>
    %82 = vector.extract_strided_slice %80 {offsets = [0, 128], sizes = [8, 128], strides = [1, 1]} : vector<8x256xf32> to vector<8x128xf32>
    %83 = vector.extract_strided_slice %71 {offsets = [0, 256], sizes = [8, 128], strides = [1, 1]} : vector<8x384xf32> to vector<8x128xf32>
    %84 = vector.extract_strided_slice %72 {offsets = [0, 256], sizes = [8, 128], strides = [1, 1]} : vector<8x384xf32> to vector<8x128xf32>
    %85 = arith.addf %84, %14 : vector<8x128xf32>
    %86 = arith.mulf %81, %85 : vector<8x128xf32>
    %87 = arith.addf %83, %86 : vector<8x128xf32>
    %88 = math.tanh %87 : vector<8x128xf32>
    %89 = arith.subf %65, %88 : vector<8x128xf32>
    %90 = arith.mulf %82, %89 : vector<8x128xf32>
    %91 = arith.addf %88, %90 : vector<8x128xf32>
    %92 = arith.index_cast %69 : i32 to index
    %c0_31 = arith.constant 0 : index
    %93 = vector.load %arg14[%92, %c0_31] : memref<64x128xf32, #tpu.memory_space<vmem>>, vector<8x128xf32>
    tpu.vector_store %arg14[%92, %c0_31], %91 {strides = array<i32>} : memref<64x128xf32, #tpu.memory_space<vmem>>, vector<8x128xf32>,
    %c3_i32 = arith.constant 3 : i32
    %c8_i32_32 = arith.constant 8 : i32
    %94 = arith.muli %c3_i32, %c8_i32_32 : i32
    %95 = tpu.assume_multiple %94, 8 : i32
    %96 = arith.index_cast %95 : i32 to index
    %c0_33 = arith.constant 0 : index
    %97 = vector.load %arg13[%96, %c0_33] : memref<64x384xf32, #tpu.memory_space<vmem>>, vector<8x384xf32>
    %cst_34 = arith.constant dense<0.000000e+00> : vector<8x384xf32>
    %98 = tpu.matmul %91, %11, %cst_34 {dimension_numbers = #tpu.dot_dimension_numbers<[1], [0], [0], [1], [0, 0, 1, 1], [], []>} : vector<8x128xf32>, vector<128x384xf32>, vector<8x384xf32> -> vector<8x384xf32>
    %99 = vector.extract_strided_slice %97 {offsets = [0, 0], sizes = [8, 256], strides = [1, 1]} : vector<8x384xf32> to vector<8x256xf32>
    %100 = vector.extract_strided_slice %98 {offsets = [0, 0], sizes = [8, 256], strides = [1, 1]} : vector<8x384xf32> to vector<8x256xf32>
    %101 = arith.addf %99, %100 : vector<8x256xf32>
    %102 = arith.negf %101 : vector<8x256xf32>
    %103 = math.exp %102 : vector<8x256xf32>
    %cst_35 = arith.constant 1.000000e+00 : f32
    %104 = vector.broadcast %cst_35 : f32 to vector<8x256xf32>
    %105 = arith.addf %104, %103 : vector<8x256xf32>
    %106 = arith.divf %104, %105 : vector<8x256xf32>
    %107 = vector.extract_strided_slice %106 {offsets = [0, 0], sizes = [8, 128], strides = [1, 1]} : vector<8x256xf32> to vector<8x128xf32>
    %108 = vector.extract_strided_slice %106 {offsets = [0, 128], sizes = [8, 128], strides = [1, 1]} : vector<8x256xf32> to vector<8x128xf32>
    %109 = vector.extract_strided_slice %97 {offsets = [0, 256], sizes = [8, 128], strides = [1, 1]} : vector<8x384xf32> to vector<8x128xf32>
    %110 = vector.extract_strided_slice %98 {offsets = [0, 256], sizes = [8, 128], strides = [1, 1]} : vector<8x384xf32> to vector<8x128xf32>
    %111 = arith.addf %110, %14 : vector<8x128xf32>
    %112 = arith.mulf %107, %111 : vector<8x128xf32>
    %113 = arith.addf %109, %112 : vector<8x128xf32>
    %114 = math.tanh %113 : vector<8x128xf32>
    %115 = arith.subf %91, %114 : vector<8x128xf32>
    %116 = arith.mulf %108, %115 : vector<8x128xf32>
    %117 = arith.addf %114, %116 : vector<8x128xf32>
    %118 = arith.index_cast %95 : i32 to index
    %c0_36 = arith.constant 0 : index
    %119 = vector.load %arg14[%118, %c0_36] : memref<64x128xf32, #tpu.memory_space<vmem>>, vector<8x128xf32>
    tpu.vector_store %arg14[%118, %c0_36], %117 {strides = array<i32>} : memref<64x128xf32, #tpu.memory_space<vmem>>, vector<8x128xf32>,
    %c4_i32 = arith.constant 4 : i32
    %c8_i32_37 = arith.constant 8 : i32
    %120 = arith.muli %c4_i32, %c8_i32_37 : i32
    %121 = tpu.assume_multiple %120, 8 : i32
    %122 = arith.index_cast %121 : i32 to index
    %c0_38 = arith.constant 0 : index
    %123 = vector.load %arg13[%122, %c0_38] : memref<64x384xf32, #tpu.memory_space<vmem>>, vector<8x384xf32>
    %cst_39 = arith.constant dense<0.000000e+00> : vector<8x384xf32>
    %124 = tpu.matmul %117, %11, %cst_39 {dimension_numbers = #tpu.dot_dimension_numbers<[1], [0], [0], [1], [0, 0, 1, 1], [], []>} : vector<8x128xf32>, vector<128x384xf32>, vector<8x384xf32> -> vector<8x384xf32>
    %125 = vector.extract_strided_slice %123 {offsets = [0, 0], sizes = [8, 256], strides = [1, 1]} : vector<8x384xf32> to vector<8x256xf32>
    %126 = vector.extract_strided_slice %124 {offsets = [0, 0], sizes = [8, 256], strides = [1, 1]} : vector<8x384xf32> to vector<8x256xf32>
    %127 = arith.addf %125, %126 : vector<8x256xf32>
    %128 = arith.negf %127 : vector<8x256xf32>
    %129 = math.exp %128 : vector<8x256xf32>
    %cst_40 = arith.constant 1.000000e+00 : f32
    %130 = vector.broadcast %cst_40 : f32 to vector<8x256xf32>
    %131 = arith.addf %130, %129 : vector<8x256xf32>
    %132 = arith.divf %130, %131 : vector<8x256xf32>
    %133 = vector.extract_strided_slice %132 {offsets = [0, 0], sizes = [8, 128], strides = [1, 1]} : vector<8x256xf32> to vector<8x128xf32>
    %134 = vector.extract_strided_slice %132 {offsets = [0, 128], sizes = [8, 128], strides = [1, 1]} : vector<8x256xf32> to vector<8x128xf32>
    %135 = vector.extract_strided_slice %123 {offsets = [0, 256], sizes = [8, 128], strides = [1, 1]} : vector<8x384xf32> to vector<8x128xf32>
    %136 = vector.extract_strided_slice %124 {offsets = [0, 256], sizes = [8, 128], strides = [1, 1]} : vector<8x384xf32> to vector<8x128xf32>
    %137 = arith.addf %136, %14 : vector<8x128xf32>
    %138 = arith.mulf %133, %137 : vector<8x128xf32>
    %139 = arith.addf %135, %138 : vector<8x128xf32>
    %140 = math.tanh %139 : vector<8x128xf32>
    %141 = arith.subf %117, %140 : vector<8x128xf32>
    %142 = arith.mulf %134, %141 : vector<8x128xf32>
    %143 = arith.addf %140, %142 : vector<8x128xf32>
    %144 = arith.index_cast %121 : i32 to index
    %c0_41 = arith.constant 0 : index
    %145 = vector.load %arg14[%144, %c0_41] : memref<64x128xf32, #tpu.memory_space<vmem>>, vector<8x128xf32>
    tpu.vector_store %arg14[%144, %c0_41], %143 {strides = array<i32>} : memref<64x128xf32, #tpu.memory_space<vmem>>, vector<8x128xf32>,
    %c5_i32 = arith.constant 5 : i32
    %c8_i32_42 = arith.constant 8 : i32
    %146 = arith.muli %c5_i32, %c8_i32_42 : i32
    %147 = tpu.assume_multiple %146, 8 : i32
    %148 = arith.index_cast %147 : i32 to index
    %c0_43 = arith.constant 0 : index
    %149 = vector.load %arg13[%148, %c0_43] : memref<64x384xf32, #tpu.memory_space<vmem>>, vector<8x384xf32>
    %cst_44 = arith.constant dense<0.000000e+00> : vector<8x384xf32>
    %150 = tpu.matmul %143, %11, %cst_44 {dimension_numbers = #tpu.dot_dimension_numbers<[1], [0], [0], [1], [0, 0, 1, 1], [], []>} : vector<8x128xf32>, vector<128x384xf32>, vector<8x384xf32> -> vector<8x384xf32>
    %151 = vector.extract_strided_slice %149 {offsets = [0, 0], sizes = [8, 256], strides = [1, 1]} : vector<8x384xf32> to vector<8x256xf32>
    %152 = vector.extract_strided_slice %150 {offsets = [0, 0], sizes = [8, 256], strides = [1, 1]} : vector<8x384xf32> to vector<8x256xf32>
    %153 = arith.addf %151, %152 : vector<8x256xf32>
    %154 = arith.negf %153 : vector<8x256xf32>
    %155 = math.exp %154 : vector<8x256xf32>
    %cst_45 = arith.constant 1.000000e+00 : f32
    %156 = vector.broadcast %cst_45 : f32 to vector<8x256xf32>
    %157 = arith.addf %156, %155 : vector<8x256xf32>
    %158 = arith.divf %156, %157 : vector<8x256xf32>
    %159 = vector.extract_strided_slice %158 {offsets = [0, 0], sizes = [8, 128], strides = [1, 1]} : vector<8x256xf32> to vector<8x128xf32>
    %160 = vector.extract_strided_slice %158 {offsets = [0, 128], sizes = [8, 128], strides = [1, 1]} : vector<8x256xf32> to vector<8x128xf32>
    %161 = vector.extract_strided_slice %149 {offsets = [0, 256], sizes = [8, 128], strides = [1, 1]} : vector<8x384xf32> to vector<8x128xf32>
    %162 = vector.extract_strided_slice %150 {offsets = [0, 256], sizes = [8, 128], strides = [1, 1]} : vector<8x384xf32> to vector<8x128xf32>
    %163 = arith.addf %162, %14 : vector<8x128xf32>
    %164 = arith.mulf %159, %163 : vector<8x128xf32>
    %165 = arith.addf %161, %164 : vector<8x128xf32>
    %166 = math.tanh %165 : vector<8x128xf32>
    %167 = arith.subf %143, %166 : vector<8x128xf32>
    %168 = arith.mulf %160, %167 : vector<8x128xf32>
    %169 = arith.addf %166, %168 : vector<8x128xf32>
    %170 = arith.index_cast %147 : i32 to index
    %c0_46 = arith.constant 0 : index
    %171 = vector.load %arg14[%170, %c0_46] : memref<64x128xf32, #tpu.memory_space<vmem>>, vector<8x128xf32>
    tpu.vector_store %arg14[%170, %c0_46], %169 {strides = array<i32>} : memref<64x128xf32, #tpu.memory_space<vmem>>, vector<8x128xf32>,
    %c6_i32 = arith.constant 6 : i32
    %c8_i32_47 = arith.constant 8 : i32
    %172 = arith.muli %c6_i32, %c8_i32_47 : i32
    %173 = tpu.assume_multiple %172, 8 : i32
    %174 = arith.index_cast %173 : i32 to index
    %c0_48 = arith.constant 0 : index
    %175 = vector.load %arg13[%174, %c0_48] : memref<64x384xf32, #tpu.memory_space<vmem>>, vector<8x384xf32>
    %cst_49 = arith.constant dense<0.000000e+00> : vector<8x384xf32>
    %176 = tpu.matmul %169, %11, %cst_49 {dimension_numbers = #tpu.dot_dimension_numbers<[1], [0], [0], [1], [0, 0, 1, 1], [], []>} : vector<8x128xf32>, vector<128x384xf32>, vector<8x384xf32> -> vector<8x384xf32>
    %177 = vector.extract_strided_slice %175 {offsets = [0, 0], sizes = [8, 256], strides = [1, 1]} : vector<8x384xf32> to vector<8x256xf32>
    %178 = vector.extract_strided_slice %176 {offsets = [0, 0], sizes = [8, 256], strides = [1, 1]} : vector<8x384xf32> to vector<8x256xf32>
    %179 = arith.addf %177, %178 : vector<8x256xf32>
    %180 = arith.negf %179 : vector<8x256xf32>
    %181 = math.exp %180 : vector<8x256xf32>
    %cst_50 = arith.constant 1.000000e+00 : f32
    %182 = vector.broadcast %cst_50 : f32 to vector<8x256xf32>
    %183 = arith.addf %182, %181 : vector<8x256xf32>
    %184 = arith.divf %182, %183 : vector<8x256xf32>
    %185 = vector.extract_strided_slice %184 {offsets = [0, 0], sizes = [8, 128], strides = [1, 1]} : vector<8x256xf32> to vector<8x128xf32>
    %186 = vector.extract_strided_slice %184 {offsets = [0, 128], sizes = [8, 128], strides = [1, 1]} : vector<8x256xf32> to vector<8x128xf32>
    %187 = vector.extract_strided_slice %175 {offsets = [0, 256], sizes = [8, 128], strides = [1, 1]} : vector<8x384xf32> to vector<8x128xf32>
    %188 = vector.extract_strided_slice %176 {offsets = [0, 256], sizes = [8, 128], strides = [1, 1]} : vector<8x384xf32> to vector<8x128xf32>
    %189 = arith.addf %188, %14 : vector<8x128xf32>
    %190 = arith.mulf %185, %189 : vector<8x128xf32>
    %191 = arith.addf %187, %190 : vector<8x128xf32>
    %192 = math.tanh %191 : vector<8x128xf32>
    %193 = arith.subf %169, %192 : vector<8x128xf32>
    %194 = arith.mulf %186, %193 : vector<8x128xf32>
    %195 = arith.addf %192, %194 : vector<8x128xf32>
    %196 = arith.index_cast %173 : i32 to index
    %c0_51 = arith.constant 0 : index
    %197 = vector.load %arg14[%196, %c0_51] : memref<64x128xf32, #tpu.memory_space<vmem>>, vector<8x128xf32>
    tpu.vector_store %arg14[%196, %c0_51], %195 {strides = array<i32>} : memref<64x128xf32, #tpu.memory_space<vmem>>, vector<8x128xf32>,
    %c7_i32 = arith.constant 7 : i32
    %c8_i32_52 = arith.constant 8 : i32
    %198 = arith.muli %c7_i32, %c8_i32_52 : i32
    %199 = tpu.assume_multiple %198, 8 : i32
    %200 = arith.index_cast %199 : i32 to index
    %c0_53 = arith.constant 0 : index
    %201 = vector.load %arg13[%200, %c0_53] : memref<64x384xf32, #tpu.memory_space<vmem>>, vector<8x384xf32>
    %cst_54 = arith.constant dense<0.000000e+00> : vector<8x384xf32>
    %202 = tpu.matmul %195, %11, %cst_54 {dimension_numbers = #tpu.dot_dimension_numbers<[1], [0], [0], [1], [0, 0, 1, 1], [], []>} : vector<8x128xf32>, vector<128x384xf32>, vector<8x384xf32> -> vector<8x384xf32>
    %203 = vector.extract_strided_slice %201 {offsets = [0, 0], sizes = [8, 256], strides = [1, 1]} : vector<8x384xf32> to vector<8x256xf32>
    %204 = vector.extract_strided_slice %202 {offsets = [0, 0], sizes = [8, 256], strides = [1, 1]} : vector<8x384xf32> to vector<8x256xf32>
    %205 = arith.addf %203, %204 : vector<8x256xf32>
    %206 = arith.negf %205 : vector<8x256xf32>
    %207 = math.exp %206 : vector<8x256xf32>
    %cst_55 = arith.constant 1.000000e+00 : f32
    %208 = vector.broadcast %cst_55 : f32 to vector<8x256xf32>
    %209 = arith.addf %208, %207 : vector<8x256xf32>
    %210 = arith.divf %208, %209 : vector<8x256xf32>
    %211 = vector.extract_strided_slice %210 {offsets = [0, 0], sizes = [8, 128], strides = [1, 1]} : vector<8x256xf32> to vector<8x128xf32>
    %212 = vector.extract_strided_slice %210 {offsets = [0, 128], sizes = [8, 128], strides = [1, 1]} : vector<8x256xf32> to vector<8x128xf32>
    %213 = vector.extract_strided_slice %201 {offsets = [0, 256], sizes = [8, 128], strides = [1, 1]} : vector<8x384xf32> to vector<8x128xf32>
    %214 = vector.extract_strided_slice %202 {offsets = [0, 256], sizes = [8, 128], strides = [1, 1]} : vector<8x384xf32> to vector<8x128xf32>
    %215 = arith.addf %214, %14 : vector<8x128xf32>
    %216 = arith.mulf %211, %215 : vector<8x128xf32>
    %217 = arith.addf %213, %216 : vector<8x128xf32>
    %218 = math.tanh %217 : vector<8x128xf32>
    %219 = arith.subf %195, %218 : vector<8x128xf32>
    %220 = arith.mulf %212, %219 : vector<8x128xf32>
    %221 = arith.addf %218, %220 : vector<8x128xf32>
    %222 = arith.index_cast %199 : i32 to index
    %c0_56 = arith.constant 0 : index
    %223 = vector.load %arg14[%222, %c0_56] : memref<64x128xf32, #tpu.memory_space<vmem>>, vector<8x128xf32>
    tpu.vector_store %arg14[%222, %c0_56], %221 {strides = array<i32>} : memref<64x128xf32, #tpu.memory_space<vmem>>, vector<8x128xf32>,
    %c8_i32_57 = arith.constant 8 : i32
    %c0_58 = arith.constant 0 : index
    %c0_59 = arith.constant 0 : index
    %224 = vector.load %arg12[%c0_58, %c0_59] : memref<8x128xf32, #tpu.memory_space<vmem>>, vector<8x128xf32>
    tpu.vector_store %arg12[%c0_58, %c0_59], %221 {strides = array<i32>} : memref<8x128xf32, #tpu.memory_space<vmem>>, vector<8x128xf32>,
    %c0_60 = arith.constant 0 : index
    %c0_61 = arith.constant 0 : index
    %225 = vector.load %arg14[%c0_60, %c0_61] : memref<64x128xf32, #tpu.memory_space<vmem>>, vector<64x128xf32>
    %c0_62 = arith.constant 0 : index
    %c0_63 = arith.constant 0 : index
    %226 = vector.load %arg8[%c0_62, %c0_63] : memref<128x4xf32, #tpu.memory_space<vmem>>, vector<128x4xf32>
    %cst_64 = arith.constant dense<0.000000e+00> : vector<64x4xf32>
    %227 = tpu.matmul %225, %226, %cst_64 {dimension_numbers = #tpu.dot_dimension_numbers<[1], [0], [0], [1], [0, 0, 1, 1], [], []>} : vector<64x128xf32>, vector<128x4xf32>, vector<64x4xf32> -> vector<64x4xf32>
    %c0_65 = arith.constant 0 : index
    %c0_66 = arith.constant 0 : index
    %228 = vector.load %arg9[%c0_65, %c0_66] : memref<1x4xf32, #tpu.memory_space<vmem>>, vector<1x4xf32>
    %229 = vector.broadcast %228 : vector<1x4xf32> to vector<64x4xf32>
    %230 = arith.addf %227, %229 : vector<64x4xf32>
    %231 = math.tanh %230 : vector<64x4xf32>
    %c0_67 = arith.constant 0 : index
    %c0_68 = arith.constant 0 : index
    %232 = vector.load %arg11[%c0_67, %c0_68] : memref<64x4xf32, #tpu.memory_space<vmem>>, vector<64x4xf32>
    tpu.vector_store %arg11[%c0_67, %c0_68], %231 {strides = array<i32>} : memref<64x4xf32, #tpu.memory_space<vmem>>, vector<64x4xf32>,
    return
  }
  func.func @transform_0(%arg0: i32) -> (i32, i32) {
    %c0_i32 = arith.constant 0 : i32
    %c0_i32_0 = arith.constant 0 : i32
    %c0_i32_1 = arith.constant 0 : i32
    return %c0_i32, %c0_i32_0 : i32, i32
  }
  func.func @transform_1(%arg0: i32) -> (i32, i32) {
    %c0_i32 = arith.constant 0 : i32
    %c0_i32_0 = arith.constant 0 : i32
    %c0_i32_1 = arith.constant 0 : i32
    return %c0_i32, %c0_i32_0 : i32, i32
  }
  func.func @transform_2(%arg0: i32) -> (i32, i32) {
    %c0_i32 = arith.constant 0 : i32
    %c0_i32_0 = arith.constant 0 : i32
    %c0_i32_1 = arith.constant 0 : i32
    return %c0_i32, %c0_i32_0 : i32, i32
  }
  func.func @transform_3(%arg0: i32) -> (i32, i32) {
    %c0_i32 = arith.constant 0 : i32
    %c0_i32_0 = arith.constant 0 : i32
    %c0_i32_1 = arith.constant 0 : i32
    return %c0_i32, %c0_i32_0 : i32, i32
  }
  func.func @transform_4(%arg0: i32) -> (i32, i32) {
    %c0_i32 = arith.constant 0 : i32
    %c0_i32_0 = arith.constant 0 : i32
    %c0_i32_1 = arith.constant 0 : i32
    return %c0_i32, %c0_i32_0 : i32, i32
  }
  func.func @transform_5(%arg0: i32) -> (i32, i32) {
    %c0_i32 = arith.constant 0 : i32
    %c0_i32_0 = arith.constant 0 : i32
    %c0_i32_1 = arith.constant 0 : i32
    return %c0_i32, %c0_i32_0 : i32, i32
  }
  func.func @transform_6(%arg0: i32) -> (i32, i32) {
    %c0_i32 = arith.constant 0 : i32
    %c0_i32_0 = arith.constant 0 : i32
    %c0_i32_1 = arith.constant 0 : i32
    return %c0_i32, %c0_i32_0 : i32, i32
  }
  func.func @transform_7(%arg0: i32) -> (i32, i32) {
    %c0_i32 = arith.constant 0 : i32
    %c0_i32_0 = arith.constant 0 : i32
    %c0_i32_1 = arith.constant 0 : i32
    return %c0_i32, %c0_i32_0 : i32, i32
  }
  func.func @transform_8(%arg0: i32) -> (i32, i32) {
    %c0_i32 = arith.constant 0 : i32
    %c0_i32_0 = arith.constant 0 : i32
    %c0_i32_1 = arith.constant 0 : i32
    return %c0_i32, %c0_i32_0 : i32, i32
  }
  func.func @transform_9(%arg0: i32) -> (i32, i32) {
    %c0_i32 = arith.constant 0 : i32
    %c0_i32_0 = arith.constant 0 : i32
    %c0_i32_1 = arith.constant 0 : i32
    return %c0_i32, %c0_i32_0 : i32, i32
  }
  func.func @transform_10(%arg0: i32) -> (i32, i32) {
    %c0_i32 = arith.constant 0 : i32
    %c0_i32_0 = arith.constant 0 : i32
    %c0_i32_1 = arith.constant 0 : i32
    return %c0_i32, %c0_i32_0 : i32, i32
  }
  func.func @transform_11(%arg0: i32) -> (i32, i32) {
    %c0_i32 = arith.constant 0 : i32
    %c0_i32_0 = arith.constant 0 : i32
    %c0_i32_1 = arith.constant 0 : i32
    return %c0_i32, %c0_i32_0 : i32, i32
  }
}

</mosaic_0001>

<bundles_post_ra>
// kernel: tpu_custom_call.1
= control target key start
LH: loop header
LB: loop body
LE: loop exit
PB: predicated region body
PF: predicated region fallthrough
CT: control target
= control target key end

     0   :  { %17 = vsyncpa [#allocation5], 0  ;;  %s2915_s0 = inlined_call_operand.vmem [shape: f32[64,4], index: 0, kind: input, shape index: {}]   ;;  %s2916_s1 = inlined_call_operand.vmem [shape: f32[64,4], index: 1, kind: input, shape index: {}]   ;;  %s2917_s2 = inlined_call_operand.vmem [shape: f32[4,384], index: 2, kind: input, shape index: {}]   ;;  %s2918_s3 = inlined_call_operand.vmem [shape: f32[4,384], index: 3, kind: input, shape index: {}]   ;;  %s2919_s4 = inlined_call_operand.hbm [shape: f32[128,384], index: 4, kind: input, shape index: {}]   ;;  %s2920_s5 = inlined_call_operand.vmem [shape: f32[1,384], index: 5, kind: input, shape index: {}]   ;;  %s2921_s6 = inlined_call_operand.vmem [shape: f32[1,128], index: 6, kind: input, shape index: {}]   ;;  %s2922_s7 = inlined_call_operand.vmem [shape: f32[128,4], index: 7, kind: input, shape index: {}]   ;;  %s2923_s8 = inlined_call_operand.vmem [shape: f32[1,4], index: 8, kind: input, shape index: {}]   ;;  %s2924_s9 = inlined_call_operand.vmem [shape: f32[8,128], index: 9, kind: input, shape index: {}]   ;;  %s2925_s10 = inlined_call_operand.vmem [shape: f32[64,4], index: 10, kind: output, shape index: {0}]   ;;  %s2926_s11 = inlined_call_operand.hbm [shape: f32[8,128], index: 11, kind: output, shape index: {1}]  }
   0x1   :  { %18 = vsyncpa [#allocation6], 0  ;;  %s31_s19 = sshll.u32 %s2919_s4, 4  ;;  %s1815_s20 = smov [#allocation4]   ;;  %s32_s19 = int_to_ptr.hbm [resolvable:$true] %s31_s19 }
   0x2   :  { %s33_s21 = sshll.u32 %s1815_s20, 4  ;;  %s1816_s22 = smov 384   ;;  %s34_s21 = int_to_ptr.vmem [resolvable:$true] %s33_s21 }
   0x3   :  { %s1817_s23 = smov 24  }
   0x4   :  { %39 = dma.hbm_to_vmem [thread:$0]  %s32_s19, 6144, %s34_s21, [#allocation5], %s1816_s22, %s1816_s22, %s1817_s23  }
   0x5   :  { %1811 = dma.done.wait [#allocation5], 6144  }
   0x6   :  { %1812 = vsyncadd [#allocation5], 4294961152  ;;  %v72_v0 = vld [vmem:[%s2918_s3] sm:$0xff]  ;;  %v73_v1 = vld [vmem:[%s2918_s3 + $0x8] sm:$0xf]  ;;  %vm107_vm0 = vcmask 1043456  }
   0x7   :  { %76 = vst [vmem:[#allocation1] ss:$2 sm:$0xff] %v72_v0  ;;  %v62_v2 = vld [vmem:[%s2917_s2] sm:$0xff]  ;;  %vm82_vm1 = vcmask 31744   ;;  %v1897_v4 = vld [vmem:[%s2916_s1 + $0x18] sm:$0xff]  ;;  %v1902_v5 = vld [vmem:[%s2916_s1 + $0x30] sm:$0xff] }
   0x8   :  { %78 = vst [vmem:[#allocation1 + $0x10] ss:$2 sm:$0xff] %v73_v1  ;;  %v64_v3 = vld [vmem:[%s2916_s1] sm:$0xff]  ;;  %v63_v6 = vld [vmem:[%s2917_s2 + $0x8] sm:$0xf]  ;;  %v1911_v10 = vld [vmem:[#allocation4 + $0x168] sm:$0xff] }
   0x9   :  { %v1919_v11 = vld [vmem:[#allocation4 + $0x150] sm:$0xff]  ;;  %v1922_v12 = vld [vmem:[#allocation4 + $0x138] sm:$0xff]  ;;  %v65_v13 = vld [vmem:[%s2916_s1 + $0x8] sm:$0xff]  ;;  %s1521_s20 = sshll.u32 %s2926_s11, 4  ;;  %s1522_s20 = int_to_ptr.hbm [resolvable:$true] %s1521_s20 }
   0xa   :  { %v1928_v14 = vld [vmem:[#allocation4 + $0x170] sm:$0xff]  ;;  %v1933_v15 = vld [vmem:[%s2916_s1 + $0x20] sm:$0xff]  ;;  %v1942_v18 = vld [vmem:[#allocation4 + $0x120] sm:$0xff] }
   0xb   :  { %v1938_v16 = vld [vmem:[%s2916_s1 + $0x38] sm:$0xff]  ;;  %v1950_v19 = vld [vmem:[#allocation4 + $0x108] sm:$0xff]  ;;  %v1952_v20 = vld [vmem:[#allocation4 + $0x158] sm:$0xff] }
   0xc   :  { %v1956_v21 = vld [vmem:[#allocation4 + $0x140] sm:$0xff]  ;;  %v1958_v22 = vld [vmem:[#allocation4 + $0xf0] sm:$0xff]  ;;  %v66_v23 = vld [vmem:[%s2916_s1 + $0x10] sm:$0xff] }
   0xd   :  { %v1968_v24 = vld [vmem:[%s2916_s1 + $0x28] sm:$0xff]  ;;  %v1973_v25 = vld [vmem:[%s2915_s0] sm:$0xff]  ;;  %v1983_v27 = vld [vmem:[#allocation4 + $0x128] sm:$0xff] }
   0xe   :  { %v79_v7 = vld.sshfl [vmem:[#allocation1] sm:$0xff pattern:$0x75316420]  ;;  %v80_v8 = vld.sshfl [vmem:[#allocation1 + $0x8] sm:$0xff pattern:$0x75316420] }
   0xf   :  { %1540 = vmatpush.msk.msra.mxu1 %vm107_vm0, %v79_v7  ;;  %239 = vst [vmem:[#allocation1] ss:$2 sm:$0xff] %v62_v2  ;;  %1610 = vmatpush.msk.msra.mxu2 %vm107_vm0, %v79_v7  ;;  %v81_v9 = vld.sshfl [vmem:[#allocation1 + $0x10] sm:$0xff pattern:$0x75316420]  ;;  %v1981_v26 = vld [vmem:[#allocation4 + $0xd8] sm:$0xff] }
  0x10   :  { %1611 = vmatpush.msk.msra.mxu3 %vm107_vm0, %v79_v7  ;;  %1541 = vmatmul.msk.f32.vlgmr.msra.gmra.mxu1 %vm82_vm1, %v64_v3  ;;  %241 = vst [vmem:[#allocation1 + $0x10] ss:$2 sm:$0xff] %v63_v6  ;;  %v1985_v28 = vld [vmem:[#allocation4 + $0xc0] sm:$0xff]  ;;  %v1989_v29 = vld [vmem:[#allocation4 + $0x110] sm:$0xff]  ;;  %v2002_v31 = vld [vmem:[#allocation4 + $0xa8] sm:$0xff] }
  0x11   :  { %1544 = vmatmul.msk.f32.vlgmr.msra.gmra.mxu2 %vm82_vm1, %v1897_v4  ;;  %1547 = vmatmul.msk.f32.vlgmr.msra.gmra.mxu3 %vm82_vm1, %v1902_v5  ;;  %v1996_v30 = vld [vmem:[%s2915_s0 + $0x8] sm:$0xff]  ;;  %v2004_v33 = vld [vmem:[#allocation4 + $0xf8] sm:$0xff]  ;;  %v2008_v35 = vld [vmem:[#allocation4 + $0x90] sm:$0xff] }
  0x12   :  { %1558 = vmatpush.msk.msrb.mxu2 %vm107_vm0, %v81_v9  ;;  %1549 = vmatpush.msk.msrb.mxu1 %vm107_vm0, %v80_v8  ;;  %v2010_v36 = vld [vmem:[#allocation4 + $0xe0] sm:$0xff]  ;;  %v2017_v37 = vld [vmem:[#allocation4 + $0xc8] sm:$0xff]  ;;  %v2032_v39 = vld [vmem:[#allocation4 + $0x78] sm:$0xff] }
  0x13   :  { %v2024_v38 = vld [vmem:[%s2915_s0 + $0x10] sm:$0xff]  ;;  %2969 = vst [vmem:[#allocation10_spill] sm:$0xff] %v2032_v39  ;;  %v2034_v40 = vld [vmem:[#allocation4 + $0xb0] sm:$0xff]  ;;  %v2036_v41 = vld [vmem:[#allocation4 + $0x98] sm:$0xff] }
  0x14   :  { %513 = vmatpush.msra.mxu2 %v1911_v10  ;;  %v2040_v42 = vld [vmem:[#allocation4 + $0x60] sm:$0xff]  ;;  %v2048_v44 = vld [vmem:[#allocation4 + $0x68] sm:$0xff]  ;;  %v2054_v45 = vld [vmem:[%s2915_s0 + $0x18] sm:$0xff] }
  0x15   :  { %2970 = vst [vmem:[#allocation11_spill] sm:$0xff] %v2040_v42  ;;  %v2044_v43 = vld [vmem:[#allocation4 + $0x80] sm:$0xff]  ;;  %v2063_v46 = vld [vmem:[#allocation4 + $0x48] sm:$0xff]  ;;  %v2065_v47 = vld [vmem:[#allocation4 + $0x50] sm:$0xff] }
  0x16   :  { %514 = vmatpush.msra.mxu2 %v1919_v11  ;;  %v242_v17 = vld.sshfl [vmem:[#allocation1] sm:$0xff pattern:$0x75316420]  ;;  %v243_v32 = vld.sshfl [vmem:[#allocation1 + $0x8] sm:$0xff pattern:$0x75316420] }
  0x17   :  { %1567 = vmatpush.msk.msrb.mxu3 %vm107_vm0, %v242_v17  ;;  %1576 = vmatpush.msk.msra.mxu0 %vm107_vm0, %v243_v32  ;;  %v244_v34 = vld.sshfl [vmem:[#allocation1 + $0x10] sm:$0xff pattern:$0x75316420]  ;;  %2971 = vst [vmem:[#allocation12_spill] sm:$0xff] %v2044_v43  ;;  %v2067_v48 = vld [vmem:[#allocation4 + $0x38] sm:$0xff]  ;;  %v2071_v49 = vld [vmem:[#allocation4 + $0x30] sm:$0xff] }
  0x18   :  { %515 = vmatpush.msra.mxu2 %v1922_v12  ;;  %1542 = vmatmul.msk.f32.gmra.mxu1 %vm82_vm1, %v65_v13  ;;  %2972 = vst [vmem:[#allocation13_spill] sm:$0xff] %v2048_v44  ;;  %v2075_v50 = vld [vmem:[#allocation4 + $0x20] sm:$0xff]  ;;  %v2079_v51 = vld [vmem:[#allocation4 + $0x8] sm:$0xff]  ;;  %v2085_v52 = vld [vmem:[%s2915_s0 + $0x20] sm:$0xff] }
  0x19   :  { %533 = vmatpush.msra.mxu3 %v1928_v14  ;;  %1545 = vmatmul.msk.f32.gmra.mxu2 %vm82_vm1, %v1933_v15  ;;  %2973 = vst [vmem:[#allocation14_spill] sm:$0xff] %v2063_v46  ;;  %v2096_v53 = vld [vmem:[#allocation4 + $0x18] sm:$0xff]  ;;  %v2098_v54 = vld [vmem:[#allocation4] sm:$0xff]  ;;  %v2128_v58 = vld [vmem:[#allocation4 + $0x148] sm:$0xff] }
  0x1a   :  { %1548 = vmatmul.msk.f32.gmra.mxu3 %vm82_vm1, %v1938_v16  ;;  %516 = vmatpush.msra.mxu2 %v1942_v18  ;;  %2974 = vst [vmem:[#allocation15_spill] sm:$0xff] %v2065_v47  ;;  %v2101_v55 = vld [vmem:[#allocation4 + $0x178] sm:$0xff]  ;;  %v2108_v56 = vld [vmem:[#allocation4 + $0x160] sm:$0xff]  ;;  %v2130_v59 = vld [vmem:[#allocation4 + $0x130] sm:$0xff] }
  0x1b   :  { %534 = vmatpush.msra.mxu3 %v1952_v20  ;;  %1577 = vmatmul.msk.f32.vlgmr.msra.gmra.mxu0 %vm82_vm1, %v1973_v25  ;;  %2975 = vst [vmem:[#allocation16_spill] sm:$0xff] %v2067_v48  ;;  %v2116_v57 = vld [vmem:[%s2915_s0 + $0x28] sm:$0xff]  ;;  %v2136_v60 = vld [vmem:[#allocation4 + $0x118] sm:$0xff]  ;;  %v2148_v62 = vld [vmem:[%s2915_s0 + $0x30] sm:$0xff] }
  0x1c   :  { %517 = vmatpush.msra.mxu2 %v1950_v19  ;;  %1585 = vmatpush.msk.msra.mxu1 %vm107_vm0, %v244_v34  ;;  %2976 = vst [vmem:[#allocation17_spill] sm:$0xff] %v2071_v49  ;;  %v2141_v61 = vld [vmem:[#allocation4 + $0x100] sm:$0xff]  ;;  %v2157_v63 = vld [vmem:[#allocation4 + $0xe8] sm:$0xff]  ;;  %v2163_v0 = vld [vmem:[#allocation4 + $0xd0] sm:$0xff] }
  0x1d   :  { %535 = vmatpush.msra.mxu3 %v1956_v21  ;;  %647 = vmatpush.msrb.mxu0 %v1928_v14  ;;  %2977 = vst [vmem:[#allocation18_spill] sm:$0xff] %v2075_v50  ;;  %v2169_v1 = vld [vmem:[#allocation4 + $0xb8] sm:$0xff]  ;;  %v2174_v2 = vld [vmem:[#allocation4 + $0xa0] sm:$0xff]  ;;  %v2196_v6 = vld [vmem:[#allocation4 + $0x70] sm:$0xff] }
  0x1e   :  { %518 = vmatpush.msra.mxu2 %v1958_v22  ;;  %2978 = vst [vmem:[#allocation19_spill] sm:$0xff] %v2079_v51  ;;  %v2202_v7 = vld [vmem:[#allocation4 + $0x58] sm:$0xff]  ;;  %v2223_v9 = vld [vmem:[#allocation4 + $0x28] sm:$0xff] }
  0x1f   :  { %536 = vmatpush.msra.mxu3 %v1983_v27  ;;  %648 = vmatpush.msrb.mxu0 %v1952_v20  ;;  %2979 = vst [vmem:[#allocation20_spill] sm:$0xff] %v2096_v53  ;;  %v2214_v8 = vld [vmem:[%s2924_s9] sm:$0xff] }
  0x20   :  { %1543 = vmatmul.msk.f32.gmra.mxu1 %vm82_vm1, %v66_v23  ;;  %519 = vmatpush.msra.mxu2 %v1981_v26  ;;  %2980 = vst [vmem:[#allocation21_spill] sm:$0xff] %v2098_v54 }
  0x21   :  { %1546 = vmatmul.msk.f32.gmra.mxu2 %vm82_vm1, %v1968_v24  ;;  %537 = vmatpush.msra.mxu3 %v1989_v29  ;;  %2982 = vst [vmem:[#allocation23_spill] sm:$0xff] %v2196_v6 }
  0x22   :  { %1568 = vmatmul.msk.f32.vlgmr.msrb.gmra.mxu3 %vm82_vm1, %v1973_v25  ;;  %520 = vmatpush.msra.mxu2 %v1985_v28  ;;  %2983 = vst [vmem:[#allocation24_spill] sm:$0xff] %v2202_v7 }
  0x23   :  { %538 = vmatpush.msra.mxu3 %v2004_v33  ;;  %1578 = vmatmul.msk.f32.gmra.mxu0 %vm82_vm1, %v1996_v30  ;;  %2985 = vst [vmem:[#allocation26_spill] sm:$0xff] %v2223_v9 }
  0x24   :  { %521 = vmatpush.msra.mxu2 %v2002_v31  ;;  %649 = vmatpush.msrb.mxu0 %v1956_v21 }
  0x25   :  { %539 = vmatpush.msra.mxu3 %v2010_v36 }
  0x26   :  { %522 = vmatpush.msra.mxu2 %v2008_v35  ;;  %650 = vmatpush.msrb.mxu0 %v1983_v27 }
  0x27   :  { %540 = vmatpush.msra.mxu3 %v2017_v37 }
  0x28   :  { %1550 = vmatmul.msk.f32.vlgmr.msrb.gmra.mxu1 %vm82_vm1, %v64_v3  ;;  %523 = vmatpush.msra.mxu2 %v2032_v39 }
  0x29   :  { %1559 = vmatmul.msk.f32.vlgmr.msrb.gmra.mxu2 %vm82_vm1, %v64_v3  ;;  %541 = vmatpush.msra.mxu3 %v2034_v40  ;;  %v2181_v3 = vld [vmem:[%s2915_s0 + $0x38] sm:$0xff] }
  0x2a   :  { %1569 = vmatmul.msk.f32.gmra.mxu3 %vm82_vm1, %v1996_v30  ;;  %524 = vmatpush.msra.mxu2 %v2040_v42 }
  0x2b   :  { %542 = vmatpush.msra.mxu3 %v2036_v41  ;;  %1579 = vmatmul.msk.f32.gmra.mxu0 %vm82_vm1, %v2024_v38 }
  0x2c   :  { %525 = vmatpush.msra.mxu2 %v2063_v46  ;;  %651 = vmatpush.msrb.mxu0 %v1989_v29 }
  0x2d   :  { %543 = vmatpush.msra.mxu3 %v2044_v43  ;;  %667 = vmatpush.msrb.mxu1 %v2101_v55 }
  0x2e   :  { %526 = vmatpush.msra.mxu2 %v2071_v49  ;;  %652 = vmatpush.msrb.mxu0 %v2004_v33 }
  0x2f   :  { %544 = vmatpush.msra.mxu3 %v2048_v44  ;;  %668 = vmatpush.msrb.mxu1 %v2108_v56 }
  0x30   :  { %1551 = vmatmul.msk.f32.gmra.mxu1 %vm82_vm1, %v65_v13  ;;  %527 = vmatpush.msra.mxu2 %v2096_v53 }
  0x31   :  { %1560 = vmatmul.msk.f32.gmra.mxu2 %vm82_vm1, %v65_v13  ;;  %545 = vmatpush.msra.mxu3 %v2065_v47  ;;  %v2228_v13 = vld [vmem:[#allocation4 + $0x10] sm:$0xff] }
  0x32   :  { %1570 = vmatmul.msk.f32.gmra.mxu3 %vm82_vm1, %v2024_v38  ;;  %528 = vmatpush.msra.mxu2 %v2098_v54  ;;  %2986 = vst [vmem:[#allocation27_spill] sm:$0xff] %v2228_v13 }
  0x33   :  { %546 = vmatpush.msra.mxu3 %v2067_v48  ;;  %1580 = vmatmul.msk.f32.gmra.mxu0 %vm82_vm1, %v2054_v45 }
  0x34   :  { %553 = vmatpush.msrb.mxu2 %v2101_v55  ;;  %653 = vmatpush.msrb.mxu0 %v2010_v36 }
  0x35   :  { %547 = vmatpush.msra.mxu3 %v2075_v50  ;;  %669 = vmatpush.msrb.mxu1 %v2128_v58 }
  0x36   :  { %554 = vmatpush.msrb.mxu2 %v2108_v56  ;;  %654 = vmatpush.msrb.mxu0 %v2017_v37 }
  0x37   :  { %548 = vmatpush.msra.mxu3 %v2079_v51  ;;  %670 = vmatpush.msrb.mxu1 %v2130_v59 }
  0x38   :  { %1552 = vmatmul.msk.f32.gmra.mxu1 %vm82_vm1, %v66_v23  ;;  %555 = vmatpush.msrb.mxu2 %v2128_v58 }
  0x39   :  { %1561 = vmatmul.msk.f32.gmra.mxu2 %vm82_vm1, %v66_v23  ;;  %627 = vmatpush.msrb.mxu3 %v1911_v10 }
  0x3a   :  { %1571 = vmatmul.msk.f32.gmra.mxu3 %vm82_vm1, %v2054_v45  ;;  %556 = vmatpush.msrb.mxu2 %v2130_v59 }
  0x3b   :  { %628 = vmatpush.msrb.mxu3 %v1919_v11  ;;  %1581 = vmatmul.msk.f32.gmra.mxu0 %vm82_vm1, %v2085_v52 }
  0x3c   :  { %557 = vmatpush.msrb.mxu2 %v2136_v60  ;;  %671 = vmatpush.msrb.mxu1 %v2136_v60 }
  0x3d   :  { %629 = vmatpush.msrb.mxu3 %v1922_v12  ;;  %655 = vmatpush.msrb.mxu0 %v2034_v40 }
  0x3e   :  { %558 = vmatpush.msrb.mxu2 %v2141_v61  ;;  %672 = vmatpush.msrb.mxu1 %v2141_v61 }
  0x3f   :  { %630 = vmatpush.msrb.mxu3 %v1942_v18  ;;  %656 = vmatpush.msrb.mxu0 %v2036_v41 }
  0x40   :  { %1553 = vmatmul.msk.f32.gmra.mxu1 %vm82_vm1, %v1897_v4  ;;  %559 = vmatpush.msrb.mxu2 %v2157_v63 }
  0x41   :  { %1562 = vmatmul.msk.f32.gmra.mxu2 %vm82_vm1, %v1897_v4  ;;  %631 = vmatpush.msrb.mxu3 %v1950_v19  ;;  %v2190_v4 = vld [vmem:[#allocation4 + $0x88] sm:$0xff] }
  0x42   :  { %1572 = vmatmul.msk.f32.gmra.mxu3 %vm82_vm1, %v2085_v52  ;;  %560 = vmatpush.msrb.mxu2 %v2163_v0  ;;  %2981 = vst [vmem:[#allocation22_spill] sm:$0xff] %v2190_v4 }
  0x43   :  { %632 = vmatpush.msrb.mxu3 %v1958_v22  ;;  %1582 = vmatmul.msk.f32.gmra.mxu0 %vm82_vm1, %v2116_v57 }
  0x44   :  { %673 = vmatpush.msrb.mxu1 %v2157_v63  ;;  %561 = vmatpush.msrb.mxu2 %v2169_v1 }
  0x45   :  { %633 = vmatpush.msrb.mxu3 %v1981_v26  ;;  %657 = vmatpush.msrb.mxu0 %v2044_v43 }
  0x46   :  { %674 = vmatpush.msrb.mxu1 %v2163_v0  ;;  %562 = vmatpush.msrb.mxu2 %v2174_v2 }
  0x47   :  { %634 = vmatpush.msrb.mxu3 %v1985_v28  ;;  %658 = vmatpush.msrb.mxu0 %v2048_v44 }
  0x48   :  { %1554 = vmatmul.msk.f32.gmra.mxu1 %vm82_vm1, %v1933_v15  ;;  %563 = vmatpush.msrb.mxu2 %v2190_v4 }
  0x49   :  { %1563 = vmatmul.msk.f32.gmra.mxu2 %vm82_vm1, %v1933_v15  ;;  %635 = vmatpush.msrb.mxu3 %v2002_v31 }
  0x4a   :  { %1573 = vmatmul.msk.f32.gmra.mxu3 %vm82_vm1, %v2116_v57  ;;  %675 = vmatpush.msrb.mxu1 %v2169_v1 }
  0x4b   :  { %636 = vmatpush.msrb.mxu3 %v2008_v35  ;;  %1583 = vmatmul.msk.f32.gmra.mxu0 %vm82_vm1, %v2148_v62 }
  0x4c   :  { %564 = vmatpush.msrb.mxu2 %v2196_v6  ;;  %676 = vmatpush.msrb.mxu1 %v2174_v2 }
  0x4d   :  { %637 = vmatpush.msrb.mxu3 %v2032_v39  ;;  %659 = vmatpush.msrb.mxu0 %v2065_v47 }
  0x4e   :  { %565 = vmatpush.msrb.mxu2 %v2202_v7  ;;  %677 = vmatpush.msrb.mxu1 %v2190_v4 }
  0x4f   :  { %638 = vmatpush.msrb.mxu3 %v2040_v42  ;;  %660 = vmatpush.msrb.mxu0 %v2067_v48 }
  0x50   :  { %1555 = vmatmul.msk.f32.gmra.mxu1 %vm82_vm1, %v1968_v24 }
  0x51   :  { %1564 = vmatmul.msk.f32.gmra.mxu2 %vm82_vm1, %v1968_v24  ;;  %639 = vmatpush.msrb.mxu3 %v2063_v46 }
  0x52   :  { %1574 = vmatmul.msk.f32.gmra.mxu3 %vm82_vm1, %v2148_v62  ;;  %678 = vmatpush.msrb.mxu1 %v2196_v6 }
  0x53   :  { %1584 = vmatmul.msk.f32.gmra.mxu0 %vm82_vm1, %v2181_v3  ;;  %640 = vmatpush.msrb.mxu3 %v2071_v49 }
  0x54   :  { %679 = vmatpush.msrb.mxu1 %v2202_v7  ;;  %661 = vmatpush.msrb.mxu0 %v2075_v50 }
  0x55   :  { %641 = vmatpush.msrb.mxu3 %v2096_v53 }
  0x56   :  { %662 = vmatpush.msrb.mxu0 %v2079_v51 }
  0x57   :  { %642 = vmatpush.msrb.mxu3 %v2098_v54 }
  0x58   :  { %1556 = vmatmul.msk.f32.gmra.mxu1 %vm82_vm1, %v1902_v5  ;;  %782 = vmatpush.msra.mxu0 %v2101_v55 }
  0x59   :  { %1565 = vmatmul.msk.f32.gmra.mxu2 %vm82_vm1, %v1902_v5  ;;  %v2207_v5 = vld [vmem:[#allocation4 + $0x40] sm:$0xff] }
  0x5a   :  { %1575 = vmatmul.msk.f32.gmra.mxu3 %vm82_vm1, %v2181_v3  ;;  %2984 = vst [vmem:[#allocation25_spill] sm:$0xff] %v2207_v5  ;;  %566 = vmatpush.msrb.mxu2 %v2207_v5 }
  0x5b   :  { %680 = vmatpush.msrb.mxu1 %v2207_v5  ;;  %783 = vmatpush.msra.mxu0 %v2108_v56 }
  0x5c   :  { %567 = vmatpush.msrb.mxu2 %v2223_v9 }
  0x5d   :  { %681 = vmatpush.msrb.mxu1 %v2223_v9  ;;  %784 = vmatpush.msra.mxu0 %v2128_v58 }
  0x5e   :  { %568 = vmatpush.msrb.mxu2 %v2228_v13 }
  0x5f   :  { %682 = vmatpush.msrb.mxu1 %v2228_v13  ;;  %785 = vmatpush.msra.mxu0 %v2130_v59 }
  0x60   :  { %1557 = vmatmul.msk.f32.gmra.mxu1 %vm82_vm1, %v1938_v16 }
  0x61   :  { %1566 = vmatmul.msk.f32.gmra.mxu2 %vm82_vm1, %v1938_v16  ;;  %786 = vmatpush.msra.mxu0 %v2136_v60 }
  0x62   :  { %549 = vmatmul.f32.vlgmr.msra.gmra.mxu3 %v2214_v8 }
  0x63   :  { %762 = vmatpush.msra.mxu3 %v1928_v14  ;;  %787 = vmatpush.msra.mxu0 %v2141_v61 }
  0x65   :  { %763 = vmatpush.msra.mxu3 %v1952_v20  ;;  %788 = vmatpush.msra.mxu0 %v2157_v63 }
  0x67   :  { %764 = vmatpush.msra.mxu3 %v1956_v21  ;;  %789 = vmatpush.msra.mxu0 %v2163_v0 }
  0x68   :  { %1586 = vmatmul.msk.f32.vlgmr.msra.gmra.mxu1 %vm82_vm1, %v1973_v25 }
  0x69   :  { %529 = vmatmul.f32.vlgmr.msra.gmra.mxu2 %v2214_v8  ;;  %857 = vmatpush.msra.mxu1 %v1911_v10 }
  0x6a   :  { %742 = vmatpush.msra.mxu2 %v1911_v10  ;;  %765 = vmatpush.msra.mxu3 %v1983_v27 }
  0x6b   :  { %858 = vmatpush.msra.mxu1 %v1919_v11  ;;  %790 = vmatpush.msra.mxu0 %v2169_v1 }
  0x6c   :  { %743 = vmatpush.msra.mxu2 %v1919_v11  ;;  %766 = vmatpush.msra.mxu3 %v1989_v29 }
  0x6d   :  { %859 = vmatpush.msra.mxu1 %v1922_v12  ;;  %791 = vmatpush.msra.mxu0 %v2174_v2 }
  0x6e   :  { %744 = vmatpush.msra.mxu2 %v1922_v12  ;;  %767 = vmatpush.msra.mxu3 %v2004_v33 }
  0x6f   :  { %860 = vmatpush.msra.mxu1 %v1942_v18  ;;  %792 = vmatpush.msra.mxu0 %v2190_v4 }
  0x70   :  { %1587 = vmatmul.msk.f32.gmra.mxu1 %vm82_vm1, %v1996_v30  ;;  %745 = vmatpush.msra.mxu2 %v1942_v18 }
  0x71   :  { %569 = vmatmul.f32.vlgmr.msrb.gmra.mxu2 %v2214_v8  ;;  %768 = vmatpush.msra.mxu3 %v2010_v36 }
  0x72   :  { %746 = vmatpush.msra.mxu2 %v1950_v19  ;;  %861 = vmatpush.msra.mxu1 %v1950_v19 }
  0x73   :  { %769 = vmatpush.msra.mxu3 %v2017_v37  ;;  %793 = vmatpush.msra.mxu0 %v2196_v6 }
  0x74   :  { %747 = vmatpush.msra.mxu2 %v1958_v22  ;;  %862 = vmatpush.msra.mxu1 %v1958_v22 }
  0x75   :  { %770 = vmatpush.msra.mxu3 %v2034_v40  ;;  %794 = vmatpush.msra.mxu0 %v2202_v7 }
  0x76   :  { %748 = vmatpush.msra.mxu2 %v1981_v26  ;;  %863 = vmatpush.msra.mxu1 %v1981_v26 }
  0x77   :  { %771 = vmatpush.msra.mxu3 %v2036_v41  ;;  %795 = vmatpush.msra.mxu0 %v2207_v5 }
  0x78   :  { %1588 = vmatmul.msk.f32.gmra.mxu1 %vm82_vm1, %v2024_v38  ;;  %749 = vmatpush.msra.mxu2 %v1985_v28 }
  0x79   :  { %864 = vmatpush.msra.mxu1 %v1985_v28  ;;  %772 = vmatpush.msra.mxu3 %v2044_v43 }
  0x7a   :  { %750 = vmatpush.msra.mxu2 %v2002_v31  ;;  %796 = vmatpush.msra.mxu0 %v2223_v9 }
  0x7b   :  { %773 = vmatpush.msra.mxu3 %v2048_v44  ;;  %865 = vmatpush.msra.mxu1 %v2002_v31 }
  0x7c   :  { %751 = vmatpush.msra.mxu2 %v2008_v35  ;;  %797 = vmatpush.msra.mxu0 %v2228_v13 }
  0x7d   :  { %774 = vmatpush.msra.mxu3 %v2065_v47  ;;  %866 = vmatpush.msra.mxu1 %v2008_v35 }
  0x7e   :  { %752 = vmatpush.msra.mxu2 %v2032_v39 }
  0x7f   :  { %775 = vmatpush.msra.mxu3 %v2067_v48  ;;  %867 = vmatpush.msra.mxu1 %v2032_v39 }
  0x80   :  { %1589 = vmatmul.msk.f32.gmra.mxu1 %vm82_vm1, %v2054_v45  ;;  %753 = vmatpush.msra.mxu2 %v2040_v42 }
  0x81   :  { %776 = vmatpush.msra.mxu3 %v2075_v50  ;;  %868 = vmatpush.msra.mxu1 %v2040_v42 }
  0x82   :  { %754 = vmatpush.msra.mxu2 %v2063_v46 }
  0x83   :  { %777 = vmatpush.msra.mxu3 %v2079_v51  ;;  %869 = vmatpush.msra.mxu1 %v2063_v46 }
  0x84   :  { %755 = vmatpush.msra.mxu2 %v2071_v49 }
  0x85   :  { %870 = vmatpush.msra.mxu1 %v2071_v49 }
  0x86   :  { %756 = vmatpush.msra.mxu2 %v2096_v53 }
  0x87   :  { %871 = vmatpush.msra.mxu1 %v2096_v53 }
  0x88   :  { %1590 = vmatmul.msk.f32.gmra.mxu1 %vm82_vm1, %v2085_v52  ;;  %757 = vmatpush.msra.mxu2 %v2098_v54  ;;  %v2354_v52 = vld [vmem:[%s2920_s5] sm:$0x7]  ;;  %s1818_s5 = smov [#allocation7]  }
  0x89   :  { %872 = vmatpush.msra.mxu1 %v2098_v54  ;;  %v400_v13 = vperm.slane %v2354_v52, 0  ;;  %s1519_s21 = sshll.u32 %s1818_s5, 4  ;;  %s1520_s21 = int_to_ptr.vmem [resolvable:$true] %s1519_s21 }
  0x8a   :  { %877 = vmatpush.msrb.mxu2 %v1928_v14 }
  0x8c   :  { %878 = vmatpush.msrb.mxu2 %v1952_v20 }
  0x8d   :  { %v2319_v15 = vpop.f32.mrf.mxu1 }
  0x8e   :  { %879 = vmatpush.msrb.mxu2 %v1956_v21 }
  0x90   :  { %1591 = vmatmul.msk.f32.gmra.mxu1 %vm82_vm1, %v2116_v57  ;;  %880 = vmatpush.msrb.mxu2 %v1983_v27 }
  0x92   :  { %881 = vmatpush.msrb.mxu2 %v1989_v29 }
  0x94   :  { %v140_v16 = vpop.f32.mrf.mxu2  ;;  %v2330_v17 = vpop.f32.mrf.mxu3  ;;  %882 = vmatpush.msrb.mxu2 %v2004_v33 }
  0x95   :  { %v134_v23 = vpop.f32.mrf.mxu1 }
  0x96   :  { %883 = vmatpush.msrb.mxu2 %v2010_v36 }
  0x98   :  { %1592 = vmatmul.msk.f32.gmra.mxu1 %vm82_vm1, %v2148_v62  ;;  %884 = vmatpush.msrb.mxu2 %v2017_v37  ;;  %v333_v45 = vpop.f32.mrf.mxu0 }
  0x9a   :  { %885 = vmatpush.msrb.mxu2 %v2034_v40 }
  0x9c   :  { %v143_v24 = vpop.f32.mrf.mxu2  ;;  %886 = vmatpush.msrb.mxu2 %v2036_v41 }
  0x9d   :  { %v2338_v25 = vpop.f32.mrf.mxu3  ;;  %v137_v30 = vpop.f32.mrf.mxu1 }
  0x9e   :  { %887 = vmatpush.msrb.mxu2 %v2044_v43 }
  0xa0   :  { %1593 = vmatmul.msk.f32.gmra.mxu1 %vm82_vm1, %v2181_v3  ;;  %888 = vmatpush.msrb.mxu2 %v2048_v44  ;;  %v336_v9 = vpop.f32.mrf.mxu0 }
  0xa2   :  { %889 = vmatpush.msrb.mxu2 %v2065_v47 }
  0xa4   :  { %v146_v32 = vpop.f32.mrf.mxu2  ;;  %890 = vmatpush.msrb.mxu2 %v2067_v48 }
  0xa5   :  { %v2346_v34 = vpop.f32.mrf.mxu3  ;;  %v172_v38 = vpop.f32.mrf.mxu1 }
  0xa6   :  { %891 = vmatpush.msrb.mxu2 %v2075_v50  ;;  %v401_v50 = vperm.slane %v2354_v52, 1 }
  0xa8   :  { %892 = vmatpush.msrb.mxu2 %v2079_v51  ;;  %v339_v44 = vpop.f32.mrf.mxu0 }
  0xac   :  { %v2356_v57 = vpop.f32.mrf.mxu2 }
  0xad   :  { %v295_v62 = vpop.f32.mrf.mxu3  ;;  %v175_v54 = vpop.f32.mrf.mxu1 }
  0xae   :  { %v296_v3 = vadd.f32 %v295_v62, %v134_v23  ;;  %v337_v48 = vadd.f32 %v336_v9, %v175_v54 }
  0xb0   :  { %v2359_v53 = vadd.f32 %v400_v13, %v296_v3  ;;  %v2364_v5 = vadd.f32 %v401_v50, %v337_v48  ;;  %v342_v9 = vpop.f32.mrf.mxu0 }
  0xb2   :  { %2987 = vst [vmem:[#allocation28_spill] sm:$0xff] %v2359_v53 }
  0xb4   :  { %v2362_v49 = vpop.f32.mrf.mxu2 }
  0xb5   :  { %v298_v51 = vpop.f32.mrf.mxu3  ;;  %v178_v46 = vpop.f32.mrf.mxu1 }
  0xb6   :  { %v299_v47 = vadd.f32 %v298_v51, %v137_v30  ;;  %v340_v23 = vadd.f32 %v339_v44, %v178_v46 }
  0xb8   :  { %v2366_v7 = vadd.f32 %v400_v13, %v299_v47  ;;  %v2368_v6 = vadd.f32 %v401_v50, %v340_v23 }
  0xba   :  { %2988 = vst [vmem:[#allocation29_spill] sm:$0xff] %v2366_v7  ;;  %v345_v7 = vpop.f32.mrf.mxu0 }
  0xbb   :  { %2989 = vst [vmem:[#allocation30_spill] sm:$0xff] %v2368_v6 }
  0xbc   :  { %v219_v62 = vpop.f32.mrf.mxu2 }
  0xbd   :  { %v301_v42 = vpop.f32.mrf.mxu3  ;;  %v181_v53 = vpop.f32.mrf.mxu1 }
  0xbe   :  { %v302_v3 = vadd.f32 %v301_v42, %v140_v16  ;;  %v343_v43 = vadd.f32 %v342_v9, %v181_v53 }
  0xc0   :  { %v2370_v54 = vadd.f32 %v400_v13, %v302_v3  ;;  %v2372_v48 = vadd.f32 %v401_v50, %v343_v43 }
  0xc2   :  { %2990 = vst [vmem:[#allocation31_spill] sm:$0xff] %v2370_v54  ;;  %v348_v53 = vpop.f32.mrf.mxu0 }
  0xc3   :  { %2991 = vst [vmem:[#allocation32_spill] sm:$0xff] %v2372_v48 }
  0xc4   :  { %v222_v39 = vpop.f32.mrf.mxu2 }
  0xc5   :  { %v304_v4 = vpop.f32.mrf.mxu3  ;;  %v184_v30 = vpop.f32.mrf.mxu1 }
  0xc6   :  { %v305_v51 = vadd.f32 %v304_v4, %v143_v24  ;;  %v346_v44 = vadd.f32 %v345_v7, %v184_v30 }
  0xc8   :  { %v2374_v47 = vadd.f32 %v400_v13, %v305_v51  ;;  %v2378_v6 = vadd.f32 %v401_v50, %v346_v44 }
  0xca   :  { %2992 = vst [vmem:[#allocation33_spill] sm:$0xff] %v2374_v47  ;;  %v351_v30 = vpop.f32.mrf.mxu0 }
  0xcb   :  { %2993 = vst [vmem:[#allocation34_spill] sm:$0xff] %v2378_v6 }
  0xcc   :  { %v2376_v46 = vpop.f32.mrf.mxu2 }
  0xcd   :  { %v307_v23 = vpop.f32.mrf.mxu3  ;;  %v187_v16 = vpop.f32.mrf.mxu1 }
  0xce   :  { %v308_v42 = vadd.f32 %v307_v23, %v146_v32  ;;  %v349_v9 = vadd.f32 %v348_v53, %v187_v16 }
  0xd0   :  { %v2380_v3 = vadd.f32 %v400_v13, %v308_v42  ;;  %v2384_v4 = vadd.f32 %v401_v50, %v349_v9 }
  0xd2   :  { %2994 = vst [vmem:[#allocation35_spill] sm:$0xff] %v2380_v3  ;;  %v334_v3 = vadd.f32 %v333_v45, %v172_v38  ;;  %v354_v9 = vpop.f32.mrf.mxu0  ;;  %v2403_v38 = vperm.slane %v2354_v52, 2 }
  0xd3   :  { %2995 = vst [vmem:[#allocation36_spill] sm:$0xff] %v2384_v4 }
  0xd4   :  { %v2382_v54 = vpop.f32.mrf.mxu2 }
  0xd5   :  { %v310_v43 = vpop.f32.mrf.mxu3  ;;  %v190_v51 = vpop.f32.mrf.mxu1 }
  0xd6   :  { %v311_v24 = vadd.f32 %v310_v43, %v2330_v17  ;;  %v352_v47 = vadd.f32 %v351_v30, %v190_v51  ;;  %v407_v17 = vadd.f32 %v401_v50, %v334_v3 }
  0xd8   :  { %v2387_v7 = vadd.f32 %v400_v13, %v311_v24  ;;  %v2391_v23 = vadd.f32 %v401_v50, %v352_v47  ;;  %v293_v47 = vadd.f32 %v2346_v34, %v2319_v15 }
  0xda   :  { %2996 = vst [vmem:[#allocation37_spill] sm:$0xff] %v2387_v7 }
  0xdb   :  { %2997 = vst [vmem:[#allocation38_spill] sm:$0xff] %v2391_v23  ;;  %v406_v23 = vadd.f32 %v400_v13, %v293_v47 }
  0xdc   :  { %v2389_v44 = vpop.f32.mrf.mxu2 }
  0xdd   :  { %v313_v32 = vpop.f32.mrf.mxu3  ;;  %v193_v16 = vpop.f32.mrf.mxu1 }
  0xde   :  { %v314_v42 = vadd.f32 %v313_v32, %v2338_v25  ;;  %v355_v4 = vadd.f32 %v354_v9, %v193_v16 }
  0xe0   :  { %v2394_v53 = vadd.f32 %v400_v13, %v314_v42  ;;  %v2398_v51 = vadd.f32 %v401_v50, %v355_v4 }
  0xe2   :  { %2998 = vst [vmem:[#allocation39_spill] sm:$0xff] %v2394_v53 }
  0xe3   :  { %2999 = vst [vmem:[#allocation40_spill] sm:$0xff] %v2398_v51 }
  0xe4   :  { %v2396_v6 = vpop.f32.mrf.mxu2 }
  0xe5   :  { %v550_v43 = vpop.f32.mrf.mxu3  ;;  %v374_v24 = vpop.f32.mrf.mxu1 }
  0xe6   :  { %v574_v7 = vadd.f32 %v550_v43, %v407_v17 }
  0xe8   :  { %v1595_v30 = vmul.f32 -1.442695, %v574_v7 }
  0xea   :  { %1618 = vpow2.f32 %v1595_v30 }
  0xec   :  { %v530_v25 = vpop.f32.mrf.mxu2 }
  0xed   :  { %v573_v32 = vadd.f32 %v530_v25, %v406_v23  ;;  %v377_v42 = vpop.f32.mrf.mxu1 }
  0xee   :  { %v378_v45 = vadd.f32 %v377_v42, %v2362_v49 }
  0xef   :  { %v1594_v3 = vmul.f32 -1.442695, %v573_v32 }
  0xf0   :  { %v2407_v16 = vadd.f32 %v2403_v38, %v378_v45  ;;  %v1619_v50 = vpop.eup %1618 }
  0xf1   :  { %1620 = vpow2.f32 %v1594_v3  ;;  %v582_v34 = vadd.f32 1.0, %v1619_v50 }
  0xf3   :  { %vm603_vm7 = vweird.f32 %v582_v34 }
  0xf4   :  { %v570_v32 = vpop.f32.mrf.mxu2 }
  0xf5   :  { %v380_v4 = vpop.f32.mrf.mxu1 }
  0xf6   :  { %v381_v9 = vadd.f32 %v380_v4, %v219_v62  ;;  %v2418_v62 = vld [vmem:[%s2921_s6] ss:$0 sm:$0xff]  ;;  %v375_v4 = vadd.f32 %v374_v24, %v2356_v57 }
  0xf7   :  { %v1621_v15 = vpop.eup %1620 }
  0xf8   :  { %v581_v13 = vadd.f32 1.0, %v1621_v15  ;;  %v2410_v7 = vadd.f32 %v2403_v38, %v381_v9  ;;  %v613_v15 = vadd.f32 %v2418_v62, %v570_v32  ;;  %v607_v32 = vand.u32 2147483647, %v582_v34 }
  0xfa   :  { %1622 = vrcp.f32 %v581_v13  ;;  %v594_v42 = vand.u32 2147483648, %v581_v13  ;;  %v592_v50 = vand.u32 2147483647, %v581_v13  ;;  %vm588_vm3 = vweird.f32 %v581_v13 }
  0xfb   :  { %1624 = vrcp.f32 %v582_v34  ;;  %vm608_vm9 = vcmp.eq.f32.partialorder %v607_v32, 8.507059e+37 }
  0xfc   :  { %vm593_vm5 = vcmp.eq.f32.partialorder %v592_v50, 8.507059e+37 }
  0xfd   :  { %v383_v52 = vpop.f32.mrf.mxu1 }
  0xfe   :  { %v384_v23 = vadd.f32 %v383_v52, %v222_v39 }
 0x100   :  { %v1623_v17 = vpop.eup %1622  ;;  %v2413_v49 = vadd.f32 %v2403_v38, %v384_v23 }
 0x101   :  { %v1625_v43 = vpop.eup %1624  ;;  %v584_v47 = vmul.f32 %v1623_v17, %v581_v13  ;;  %vm589_vm2 = vweird.f32 %v1623_v17 }
 0x102   :  { %3000 = vst [vmem:[#allocation41_spill] sm:$0xff] %v2413_v49  ;;  %v599_v25 = vmul.f32 %v1625_v43, %v582_v34  ;;  %vm590_vm4 = vmor %vm588_vm3, %vm589_vm2  ;;  %vm604_vm6 = vweird.f32 %v1625_v43 }
 0x103   :  { %v585_v30 = vsub.f32 1.0, %v584_v47  ;;  %v595_v47 = vor.u32 1.1754944e-38, %v594_v42  ;;  %vm605_vm8 = vmor %vm603_vm7, %vm604_vm6 }
 0x104   :  { %v600_v52 = vsub.f32 1.0, %v599_v25  ;;  %v609_v25 = vand.u32 2147483648, %v582_v34 }
 0x105   :  { %v386_v45 = vpop.f32.mrf.mxu1  ;;  %v586_v3 = vmul.f32 %v1623_v17, %v585_v30  ;;  %v408_v30 = vadd.f32 %v2403_v38, %v375_v4 }
 0x106   :  { %v387_v39 = vadd.f32 %v386_v45, %v2376_v46  ;;  %v601_v48 = vmul.f32 %v1625_v43, %v600_v52  ;;  %v610_v42 = vor.u32 1.1754944e-38, %v609_v25 }
 0x107   :  { %v587_v9 = vadd.f32 %v1623_v17, %v586_v3 }
 0x108   :  { %v2424_v23 = vadd.f32 %v2403_v38, %v387_v39  ;;  %v602_v24 = vadd.f32 %v1625_v43, %v601_v48 }
 0x109   :  { %v591_v51 = vsel %vm590_vm4, %v1623_v17, %v587_v9  ;;  %v3024_v9 = vld [vmem:[#allocation28_spill] sm:$0xff] }
 0x10a   :  { %3001 = vst [vmem:[#allocation42_spill] sm:$0xff] %v2424_v23  ;;  %v596_v53 = vsel %vm593_vm5, %v595_v47, %v591_v51  ;;  %v606_v17 = vsel %vm605_vm8, %v1625_v43, %v602_v24 }
 0x10b   :  { %v614_v49 = vmul.f32 %v613_v15, %v596_v53 }
 0x10d   :  { %v615_v46 = vadd.f32 %v614_v49, %v408_v30  ;;  %v389_v45 = vpop.f32.mrf.mxu1 }
 0x10e   :  { %v390_v57 = vadd.f32 %v389_v45, %v2382_v54  ;;  %v611_v54 = vsel %vm608_vm9, %v610_v42, %v606_v17 }
 0x10f   :  { %1626 = vtanh.f32 %v615_v46 }
 0x110   :  { %v2429_v13 = vadd.f32 %v2403_v38, %v390_v57 }
 0x112   :  { %3002 = vst [vmem:[#allocation43_spill] sm:$0xff] %v2429_v13 }
 0x115   :  { %v1627_v51 = vpop.eup %1626  ;;  %v392_v3 = vpop.f32.mrf.mxu1 }
 0x116   :  { %v617_v53 = vsub.f32 %v2214_v8, %v1627_v51  ;;  %v393_v49 = vadd.f32 %v392_v3, %v2389_v44 }
 0x118   :  { %v2434_v48 = vadd.f32 %v2403_v38, %v393_v49  ;;  %v618_v50 = vmul.f32 %v617_v53, %v611_v54 }
 0x11a   :  { %3003 = vst [vmem:[#allocation44_spill] sm:$0xff] %v2434_v48  ;;  %v2436_v39 = vadd.f32 %v1627_v51, %v618_v50 }
 0x11c   :  { %3004 = vst [vmem:[#allocation45_spill] sm:$0xff] %v2436_v39  ;;  %643 = vmatmul.f32.vlgmr.msrb.gmra.mxu3 %v2436_v39  ;;  %663 = vmatmul.f32.vlgmr.msrb.gmra.mxu0 %v2436_v39 }
 0x11d   :  { %683 = vmatmul.f32.vlgmr.msrb.gmra.mxu1 %v2436_v39  ;;  %v395_v34 = vpop.f32.mrf.mxu1  ;;  %897 = vmatpush.msrb.mxu3 %v2101_v55 }
 0x11e   :  { %v396_v8 = vadd.f32 %v395_v34, %v2396_v6  ;;  %972 = vmatpush.msrb.mxu0 %v1911_v10  ;;  %992 = vmatpush.msrb.mxu1 %v1928_v14  ;;  %v3006_v10 = vld [vmem:[#allocation22_spill] sm:$0xff]  ;;  %v3009_v14 = vld [vmem:[#allocation23_spill] sm:$0xff] }
 0x11f   :  { %898 = vmatpush.msrb.mxu3 %v2108_v56 }
 0x120   :  { %v2447_v44 = vadd.f32 %v2403_v38, %v396_v8  ;;  %973 = vmatpush.msrb.mxu0 %v1919_v11  ;;  %993 = vmatpush.msrb.mxu1 %v1952_v20  ;;  %v3007_v11 = vld [vmem:[#allocation10_spill] sm:$0xff]  ;;  %v3012_v20 = vld [vmem:[#allocation24_spill] sm:$0xff] }
 0x121   :  { %899 = vmatpush.msrb.mxu3 %v2128_v58 }
 0x122   :  { %3005 = vst [vmem:[#allocation46_spill] sm:$0xff] %v2447_v44  ;;  %974 = vmatpush.msrb.mxu0 %v1922_v12  ;;  %994 = vmatpush.msrb.mxu1 %v1956_v21  ;;  %v3008_v12 = vld [vmem:[#allocation12_spill] sm:$0xff]  ;;  %v3013_v21 = vld [vmem:[#allocation14_spill] sm:$0xff] }
 0x123   :  { %900 = vmatpush.msrb.mxu3 %v2130_v59 }
 0x124   :  { %975 = vmatpush.msrb.mxu0 %v1942_v18  ;;  %995 = vmatpush.msrb.mxu1 %v1983_v27  ;;  %v3010_v18 = vld [vmem:[#allocation11_spill] sm:$0xff]  ;;  %v3016_v27 = vld [vmem:[#allocation17_spill] sm:$0xff] }
 0x125   :  { %901 = vmatpush.msrb.mxu3 %v2136_v60 }
 0x126   :  { %976 = vmatpush.msrb.mxu0 %v1950_v19  ;;  %996 = vmatpush.msrb.mxu1 %v1989_v29  ;;  %v3011_v19 = vld [vmem:[#allocation13_spill] sm:$0xff]  ;;  %v3018_v29 = vld [vmem:[#allocation26_spill] sm:$0xff] }
 0x127   :  { %902 = vmatpush.msrb.mxu3 %v2141_v61 }
 0x128   :  { %977 = vmatpush.msrb.mxu0 %v1958_v22  ;;  %997 = vmatpush.msrb.mxu1 %v2004_v33  ;;  %v3014_v22 = vld [vmem:[#allocation15_spill] sm:$0xff]  ;;  %v3020_v33 = vld [vmem:[#allocation18_spill] sm:$0xff] }
 0x129   :  { %903 = vmatpush.msrb.mxu3 %v2157_v63 }
 0x12a   :  { %978 = vmatpush.msrb.mxu0 %v1981_v26  ;;  %998 = vmatpush.msrb.mxu1 %v2010_v36  ;;  %v3015_v26 = vld [vmem:[#allocation25_spill] sm:$0xff] }
 0x12b   :  { %904 = vmatpush.msrb.mxu3 %v2163_v0  ;;  %v3022_v36 = vld [vmem:[#allocation21_spill] sm:$0xff] }
 0x12c   :  { %979 = vmatpush.msrb.mxu0 %v1985_v28  ;;  %999 = vmatpush.msrb.mxu1 %v2017_v37  ;;  %v3017_v28 = vld [vmem:[#allocation16_spill] sm:$0xff]  ;;  %v3023_v37 = vld [vmem:[#allocation19_spill] sm:$0xff] }
 0x12d   :  { %905 = vmatpush.msrb.mxu3 %v2169_v1 }
 0x12e   :  { %980 = vmatpush.msrb.mxu0 %v2002_v31  ;;  %1000 = vmatpush.msrb.mxu1 %v2034_v40  ;;  %v3019_v31 = vld [vmem:[#allocation20_spill] sm:$0xff] }
 0x12f   :  { %906 = vmatpush.msrb.mxu3 %v2174_v2 }
 0x130   :  { %981 = vmatpush.msrb.mxu0 %v2008_v35  ;;  %1001 = vmatpush.msrb.mxu1 %v2036_v41  ;;  %v3021_v35 = vld [vmem:[#allocation27_spill] sm:$0xff] }
 0x131   :  { %907 = vmatpush.msrb.mxu3 %v3006_v10 }
 0x132   :  { %982 = vmatpush.msrb.mxu0 %v3007_v11  ;;  %1002 = vmatpush.msrb.mxu1 %v3008_v12 }
 0x133   :  { %908 = vmatpush.msrb.mxu3 %v3009_v14 }
 0x134   :  { %983 = vmatpush.msrb.mxu0 %v3010_v18  ;;  %1003 = vmatpush.msrb.mxu1 %v3011_v19 }
 0x135   :  { %909 = vmatpush.msrb.mxu3 %v3012_v20 }
 0x136   :  { %984 = vmatpush.msrb.mxu0 %v3013_v21  ;;  %1004 = vmatpush.msrb.mxu1 %v3014_v22 }
 0x137   :  { %910 = vmatpush.msrb.mxu3 %v3015_v26 }
 0x138   :  { %985 = vmatpush.msrb.mxu0 %v3016_v27  ;;  %1005 = vmatpush.msrb.mxu1 %v3017_v28 }
 0x139   :  { %911 = vmatpush.msrb.mxu3 %v3018_v29 }
 0x13a   :  { %986 = vmatpush.msrb.mxu0 %v3019_v31  ;;  %1006 = vmatpush.msrb.mxu1 %v3020_v33 }
 0x13b   :  { %912 = vmatpush.msrb.mxu3 %v3021_v35 }
 0x13c   :  { %987 = vmatpush.msrb.mxu0 %v3022_v36  ;;  %1007 = vmatpush.msrb.mxu1 %v3023_v37 }
 0x199   :  { %v664_v6 = vpop.f32.mrf.mxu0 }
 0x19a   :  { %v688_v38 = vadd.f32 %v664_v6, %v2364_v5  ;;  %v684_v3 = vpop.f32.mrf.mxu1 }
 0x19b   :  { %v727_v50 = vadd.f32 %v2418_v62, %v684_v3  ;;  %v2556_v3 = vld [vmem:[#allocation4 + $0xc8] sm:$0xff] }
 0x19c   :  { %v1597_v43 = vmul.f32 -1.442695, %v688_v38 }
 0x19e   :  { %1628 = vpow2.f32 %v1597_v43 }
 0x19f   :  { %v644_v4 = vpop.f32.mrf.mxu3 }
 0x1a0   :  { %v687_v15 = vadd.f32 %v644_v4, %v3024_v9 }
 0x1a2   :  { %v1596_v52 = vmul.f32 -1.442695, %v687_v15 }
 0x1a4   :  { %1630 = vpow2.f32 %v1596_v52  ;;  %v1629_v47 = vpop.eup %1628 }
 0x1a5   :  { %v696_v46 = vadd.f32 1.0, %v1629_v47 }
 0x1a7   :  { %v723_v43 = vand.u32 2147483648, %v696_v46  ;;  %vm717_vm15 = vweird.f32 %v696_v46  ;;  %v721_v4 = vand.u32 2147483647, %v696_v46 }
 0x1a9   :  { %v724_v52 = vor.u32 1.1754944e-38, %v723_v43  ;;  %vm722_vm2 = vcmp.eq.f32.partialorder %v721_v4, 8.507059e+37 }
 0x1aa   :  { %v1631_v30 = vpop.eup %1630 }
 0x1ab   :  { %v695_v45 = vadd.f32 1.0, %v1631_v30 }
 0x1ad   :  { %1632 = vrcp.f32 %v695_v45  ;;  %v708_v51 = vand.u32 2147483648, %v695_v45  ;;  %v706_v42 = vand.u32 2147483647, %v695_v45  ;;  %vm702_vm11 = vweird.f32 %v695_v45 }
 0x1ae   :  { %1634 = vrcp.f32 %v696_v46 }
 0x1af   :  { %v709_v54 = vor.u32 1.1754944e-38, %v708_v51  ;;  %vm707_vm13 = vcmp.eq.f32.partialorder %v706_v42, 8.507059e+37  ;;  %v2535_v51 = vld [vmem:[#allocation4 + $0x110] sm:$0xff]  ;;  %v2549_v42 = vld [vmem:[#allocation4 + $0xe0] sm:$0xff] }
 0x1b3   :  { %v1633_v57 = vpop.eup %1632 }
 0x1b4   :  { %v1635_v24 = vpop.eup %1634  ;;  %v698_v25 = vmul.f32 %v1633_v57, %v695_v45  ;;  %vm703_vm10 = vweird.f32 %v1633_v57 }
 0x1b5   :  { %v713_v17 = vmul.f32 %v1635_v24, %v696_v46  ;;  %vm704_vm12 = vmor %vm702_vm11, %vm703_vm10  ;;  %vm718_vm14 = vweird.f32 %v1635_v24  ;;  %v2507_v46 = vld [vmem:[#allocation4 + $0x170] sm:$0xff] }
 0x1b6   :  { %v699_v32 = vsub.f32 1.0, %v698_v25  ;;  %vm719_vm0 = vmor %vm717_vm15, %vm718_vm14  ;;  %v2514_v25 = vld [vmem:[#allocation4 + $0x158] sm:$0xff] }
 0x1b7   :  { %v714_v49 = vsub.f32 1.0, %v713_v17  ;;  %v2528_v17 = vld [vmem:[#allocation4 + $0x128] sm:$0xff] }
 0x1b8   :  { %v700_v5 = vmul.f32 %v1633_v57, %v699_v32  ;;  %v2521_v32 = vld [vmem:[#allocation4 + $0x140] sm:$0xff] }
 0x1b9   :  { %v715_v18 = vmul.f32 %v1635_v24, %v714_v49 }
 0x1ba   :  { %v701_v53 = vadd.f32 %v1633_v57, %v700_v5  ;;  %v2542_v5 = vld [vmem:[#allocation4 + $0xf8] sm:$0xff] }
 0x1bb   :  { %v716_v38 = vadd.f32 %v1635_v24, %v715_v18 }
 0x1bc   :  { %v705_v34 = vsel %vm704_vm12, %v1633_v57, %v701_v53  ;;  %v2565_v53 = vld [vmem:[#allocation4 + $0x90] sm:$0xff] }
 0x1bd   :  { %v710_v8 = vsel %vm707_vm13, %v709_v54, %v705_v34  ;;  %v720_v9 = vsel %vm719_vm0, %v1635_v24, %v716_v38  ;;  %v2511_v24 = vld [vmem:[#allocation4 + $0x150] sm:$0xff] }
 0x1be   :  { %v728_v11 = vmul.f32 %v727_v50, %v710_v8  ;;  %v725_v30 = vsel %vm722_vm2, %v724_v52, %v720_v9 }
 0x1c0   :  { %v729_v6 = vadd.f32 %v728_v11, %v2407_v16  ;;  %v2504_v16 = vld [vmem:[#allocation4 + $0x168] sm:$0xff] }
 0x1c2   :  { %1636 = vtanh.f32 %v729_v6 }
 0x1c8   :  { %v1637_v15 = vpop.eup %1636 }
 0x1c9   :  { %v731_v47 = vsub.f32 %v2436_v39, %v1637_v15 }
 0x1cb   :  { %v732_v45 = vmul.f32 %v731_v47, %v725_v30 }
 0x1cd   :  { %v2498_v57 = vadd.f32 %v1637_v15, %v732_v45 }
 0x1cf   :  { %3025 = vst [vmem:[#allocation22_spill] sm:$0xff] %v2498_v57  ;;  %758 = vmatmul.f32.vlgmr.msra.gmra.mxu2 %v2498_v57  ;;  %778 = vmatmul.f32.vlgmr.msra.gmra.mxu3 %v2498_v57 }
 0x1d0   :  { %798 = vmatmul.f32.vlgmr.msra.gmra.mxu0 %v2498_v57  ;;  %1012 = vmatpush.msra.mxu2 %v2101_v55  ;;  %v2518_v55 = vld [vmem:[#allocation4 + $0x138] sm:$0xff] }
 0x1d1   :  { %1087 = vmatpush.msra.mxu3 %v2504_v16  ;;  %1107 = vmatpush.msra.mxu0 %v2507_v46 }
 0x1d2   :  { %1013 = vmatpush.msra.mxu2 %v2108_v56  ;;  %v2525_v56 = vld [vmem:[#allocation4 + $0x120] sm:$0xff] }
 0x1d3   :  { %1088 = vmatpush.msra.mxu3 %v2511_v24  ;;  %1108 = vmatpush.msra.mxu0 %v2514_v25 }
 0x1d4   :  { %1014 = vmatpush.msra.mxu2 %v2128_v58  ;;  %v2532_v58 = vld [vmem:[#allocation4 + $0x108] sm:$0xff] }
 0x1d5   :  { %1089 = vmatpush.msra.mxu3 %v2518_v55  ;;  %1109 = vmatpush.msra.mxu0 %v2521_v32 }
 0x1d6   :  { %1015 = vmatpush.msra.mxu2 %v2130_v59  ;;  %v2539_v59 = vld [vmem:[#allocation4 + $0xf0] sm:$0xff] }
 0x1d7   :  { %1090 = vmatpush.msra.mxu3 %v2525_v56  ;;  %1110 = vmatpush.msra.mxu0 %v2528_v17 }
 0x1d8   :  { %1016 = vmatpush.msra.mxu2 %v2136_v60  ;;  %v2546_v60 = vld [vmem:[#allocation4 + $0xd8] sm:$0xff] }
 0x1d9   :  { %1091 = vmatpush.msra.mxu3 %v2532_v58  ;;  %1111 = vmatpush.msra.mxu0 %v2535_v51 }
 0x1da   :  { %1017 = vmatpush.msra.mxu2 %v2141_v61  ;;  %v2553_v61 = vld [vmem:[#allocation4 + $0xc0] sm:$0xff] }
 0x1db   :  { %1092 = vmatpush.msra.mxu3 %v2539_v59  ;;  %1112 = vmatpush.msra.mxu0 %v2542_v5 }
 0x1dc   :  { %1018 = vmatpush.msra.mxu2 %v2157_v63  ;;  %v2560_v63 = vld [vmem:[#allocation4 + $0xa8] sm:$0xff] }
 0x1dd   :  { %1093 = vmatpush.msra.mxu3 %v2546_v60  ;;  %1113 = vmatpush.msra.mxu0 %v2549_v42 }
 0x1de   :  { %1019 = vmatpush.msra.mxu2 %v2163_v0  ;;  %v2570_v0 = vld [vmem:[#allocation4 + $0x78] sm:$0xff] }
 0x1df   :  { %1094 = vmatpush.msra.mxu3 %v2553_v61  ;;  %1114 = vmatpush.msra.mxu0 %v2556_v3 }
 0x1e0   :  { %1020 = vmatpush.msra.mxu2 %v2169_v1  ;;  %v2575_v1 = vld [vmem:[#allocation4 + $0x60] sm:$0xff] }
 0x1e1   :  { %1095 = vmatpush.msra.mxu3 %v2560_v63  ;;  %1115 = vmatpush.msra.mxu0 %v2034_v40 }
 0x1e2   :  { %1021 = vmatpush.msra.mxu2 %v2174_v2  ;;  %v3026_v2 = vld [vmem:[#allocation29_spill] sm:$0xff] }
 0x1e3   :  { %1096 = vmatpush.msra.mxu3 %v2565_v53  ;;  %1116 = vmatpush.msra.mxu0 %v2036_v41 }
 0x1e4   :  { %1022 = vmatpush.msra.mxu2 %v3006_v10 }
 0x1e5   :  { %1097 = vmatpush.msra.mxu3 %v2570_v0  ;;  %1117 = vmatpush.msra.mxu0 %v3008_v12  ;;  %v3027_v12 = vld [vmem:[#allocation30_spill] sm:$0xff] }
 0x1e6   :  { %1023 = vmatpush.msra.mxu2 %v3009_v14 }
 0x1e7   :  { %1098 = vmatpush.msra.mxu3 %v2575_v1  ;;  %1118 = vmatpush.msra.mxu0 %v3011_v19 }
 0x1e8   :  { %1024 = vmatpush.msra.mxu2 %v3012_v20 }
 0x1e9   :  { %1099 = vmatpush.msra.mxu3 %v3013_v21  ;;  %1119 = vmatpush.msra.mxu0 %v3014_v22 }
 0x1ea   :  { %1025 = vmatpush.msra.mxu2 %v3015_v26 }
 0x1eb   :  { %1100 = vmatpush.msra.mxu3 %v3016_v27  ;;  %1120 = vmatpush.msra.mxu0 %v3017_v28 }
 0x1ec   :  { %1026 = vmatpush.msra.mxu2 %v3018_v29 }
 0x1ed   :  { %1101 = vmatpush.msra.mxu3 %v3019_v31  ;;  %1121 = vmatpush.msra.mxu0 %v3020_v33 }
 0x1ee   :  { %1027 = vmatpush.msra.mxu2 %v3021_v35 }
 0x1ef   :  { %1102 = vmatpush.msra.mxu3 %v3022_v36  ;;  %1122 = vmatpush.msra.mxu0 %v3023_v37 }
 0x24d   :  { %v799_v34 = vpop.f32.mrf.mxu0 }
 0x24e   :  { %v842_v6 = vadd.f32 %v2418_v62, %v799_v34  ;;  %v2666_v34 = vld [vmem:[#allocation4 + $0x68] sm:$0xff] }
 0x252   :  { %v759_v40 = vpop.f32.mrf.mxu2  ;;  %v779_v41 = vpop.f32.mrf.mxu3 }
 0x253   :  { %v802_v10 = vadd.f32 %v759_v40, %v3026_v2  ;;  %v803_v14 = vadd.f32 %v779_v41, %v3027_v12 }
 0x255   :  { %v1598_v19 = vmul.f32 -1.442695, %v802_v10  ;;  %v1599_v20 = vmul.f32 -1.442695, %v803_v14 }
 0x257   :  { %1638 = vpow2.f32 %v1598_v19  ;;  %v2606_v19 = vld [vmem:[#allocation4 + $0x160] sm:$0xff] }
 0x258   :  { %1640 = vpow2.f32 %v1599_v20  ;;  %v2611_v20 = vld [vmem:[#allocation4 + $0x148] sm:$0xff] }
 0x25d   :  { %v1639_v21 = vpop.eup %1638 }
 0x25e   :  { %v1641_v22 = vpop.eup %1640  ;;  %v810_v26 = vadd.f32 1.0, %v1639_v21  ;;  %v2616_v21 = vld [vmem:[#allocation4 + $0x130] sm:$0xff] }
 0x25f   :  { %v811_v27 = vadd.f32 1.0, %v1641_v22  ;;  %v2621_v22 = vld [vmem:[#allocation4 + $0x118] sm:$0xff] }
 0x260   :  { %1642 = vrcp.f32 %v810_v26  ;;  %v823_v37 = vand.u32 2147483648, %v810_v26  ;;  %v821_v50 = vand.u32 2147483647, %v810_v26  ;;  %vm817_vm4 = vweird.f32 %v810_v26 }
 0x261   :  { %1644 = vrcp.f32 %v811_v27  ;;  %v838_v47 = vand.u32 2147483648, %v811_v27  ;;  %vm832_vm8 = vweird.f32 %v811_v27  ;;  %v836_v30 = vand.u32 2147483647, %v811_v27 }
 0x262   :  { %v824_v11 = vor.u32 1.1754944e-38, %v823_v37  ;;  %vm822_vm6 = vcmp.eq.f32.partialorder %v821_v50, 8.507059e+37  ;;  %v2652_v37 = vld [vmem:[#allocation4 + $0x98] sm:$0xff]  ;;  %v2662_v50 = vld [vmem:[#allocation4 + $0x70] sm:$0xff] }
 0x263   :  { %v839_v41 = vor.u32 1.1754944e-38, %v838_v47  ;;  %vm837_vm10 = vcmp.eq.f32.partialorder %v836_v30, 8.507059e+37 }
 0x266   :  { %v1643_v28 = vpop.eup %1642 }
 0x267   :  { %v1645_v31 = vpop.eup %1644  ;;  %v813_v33 = vmul.f32 %v1643_v28, %v810_v26  ;;  %vm818_vm3 = vweird.f32 %v1643_v28  ;;  %v2626_v26 = vld [vmem:[#allocation4 + $0x100] sm:$0xff] }
 0x268   :  { %v828_v49 = vmul.f32 %v1645_v31, %v811_v27  ;;  %vm819_vm5 = vmor %vm817_vm4, %vm818_vm3  ;;  %vm833_vm7 = vweird.f32 %v1645_v31  ;;  %v2631_v27 = vld [vmem:[#allocation4 + $0xe8] sm:$0xff] }
 0x269   :  { %v814_v36 = vsub.f32 1.0, %v813_v33  ;;  %vm834_vm9 = vmor %vm832_vm8, %vm833_vm7  ;;  %v2645_v33 = vld [vmem:[#allocation4 + $0xb0] sm:$0xff] }
 0x26a   :  { %v829_v18 = vsub.f32 1.0, %v828_v49  ;;  %v2655_v49 = vld [vmem:[#allocation4 + $0x88] sm:$0xff] }
 0x26b   :  { %v815_v54 = vmul.f32 %v1643_v28, %v814_v36  ;;  %v2648_v36 = vld [vmem:[#allocation4 + $0xa0] sm:$0xff] }
 0x26c   :  { %v830_v9 = vmul.f32 %v1645_v31, %v829_v18  ;;  %v2675_v18 = vld [vmem:[#allocation4 + $0x50] sm:$0xff] }
 0x26d   :  { %v816_v8 = vadd.f32 %v1643_v28, %v815_v54  ;;  %v2659_v54 = vld [vmem:[#allocation4 + $0x80] sm:$0xff] }
 0x26e   :  { %v831_v52 = vadd.f32 %v1645_v31, %v830_v9  ;;  %v2691_v9 = vld [vmem:[#allocation4 + $0x20] sm:$0xff] }
 0x26f   :  { %v820_v38 = vsel %vm819_vm5, %v1643_v28, %v816_v8  ;;  %v2636_v28 = vld [vmem:[#allocation4 + $0xd0] sm:$0xff]  ;;  %v2669_v8 = vld [vmem:[#allocation4 + $0x58] sm:$0xff]  ;;  %3031 = vst [vmem:[#allocation11_spill] sm:$0xff] %v2691_v9 }
 0x270   :  { %v825_v43 = vsel %vm822_vm6, %v824_v11, %v820_v38  ;;  %v835_v45 = vsel %vm834_vm9, %v1645_v31, %v831_v52  ;;  %v2641_v31 = vld [vmem:[#allocation4 + $0xb8] sm:$0xff]  ;;  %v2672_v11 = vld [vmem:[#allocation4 + $0x48] sm:$0xff]  ;;  %v2681_v38 = vld [vmem:[#allocation4 + $0x30] sm:$0xff] }
 0x271   :  { %v843_v4 = vmul.f32 %v842_v6, %v825_v43  ;;  %v840_v10 = vsel %vm837_vm10, %v839_v41, %v835_v45  ;;  %v2678_v6 = vld [vmem:[#allocation4 + $0x40] sm:$0xff]  ;;  %3028 = vst [vmem:[#allocation10_spill] sm:$0xff] %v2681_v38  ;;  %v2684_v43 = vld [vmem:[#allocation4 + $0x38] sm:$0xff]  ;;  %v2698_v52 = vld [vmem:[#allocation4 + $0x8] sm:$0xff] }
 0x272   :  { %3029 = vst [vmem:[#allocation12_spill] sm:$0xff] %v2684_v43  ;;  %v3035_v41 = vld [vmem:[#allocation32_spill] sm:$0xff] }
 0x273   :  { %v844_v15 = vadd.f32 %v843_v4, %v2410_v7  ;;  %v2601_v7 = vld [vmem:[#allocation4 + $0x178] sm:$0xff]  ;;  %3033 = vst [vmem:[#allocation24_spill] sm:$0xff] %v2698_v52 }
 0x274   :  { %v2688_v4 = vld [vmem:[#allocation4 + $0x18] sm:$0xff] }
 0x275   :  { %1646 = vtanh.f32 %v844_v15  ;;  %3030 = vst [vmem:[#allocation23_spill] sm:$0xff] %v2688_v4  ;;  %v2695_v15 = vld [vmem:[#allocation4] sm:$0xff] }
 0x276   :  { %3032 = vst [vmem:[#allocation13_spill] sm:$0xff] %v2695_v15 }
 0x27b   :  { %v1647_v40 = vpop.eup %1646 }
 0x27c   :  { %v846_v2 = vsub.f32 %v2498_v57, %v1647_v40 }
 0x27e   :  { %v847_v12 = vmul.f32 %v846_v2, %v840_v10 }
 0x280   :  { %v2596_v14 = vadd.f32 %v1647_v40, %v847_v12 }
 0x282   :  { %873 = vmatmul.f32.vlgmr.msra.gmra.mxu1 %v2596_v14  ;;  %893 = vmatmul.f32.vlgmr.msrb.gmra.mxu2 %v2596_v14 }
 0x283   :  { %913 = vmatmul.f32.vlgmr.msrb.gmra.mxu3 %v2596_v14  ;;  %1127 = vmatpush.msra.mxu1 %v2601_v7 }
 0x284   :  { %1202 = vmatpush.msrb.mxu2 %v2504_v16  ;;  %1222 = vmatpush.msrb.mxu3 %v2507_v46 }
 0x285   :  { %1128 = vmatpush.msra.mxu1 %v2606_v19 }
 0x286   :  { %1203 = vmatpush.msrb.mxu2 %v2511_v24  ;;  %1223 = vmatpush.msrb.mxu3 %v2514_v25 }
 0x287   :  { %1129 = vmatpush.msra.mxu1 %v2611_v20 }
 0x288   :  { %1204 = vmatpush.msrb.mxu2 %v2518_v55  ;;  %1224 = vmatpush.msrb.mxu3 %v2521_v32 }
 0x289   :  { %1130 = vmatpush.msra.mxu1 %v2616_v21 }
 0x28a   :  { %1205 = vmatpush.msrb.mxu2 %v2525_v56  ;;  %1225 = vmatpush.msrb.mxu3 %v2528_v17 }
 0x28b   :  { %1131 = vmatpush.msra.mxu1 %v2621_v22 }
 0x28c   :  { %1206 = vmatpush.msrb.mxu2 %v2532_v58  ;;  %1226 = vmatpush.msrb.mxu3 %v2535_v51 }
 0x28d   :  { %1132 = vmatpush.msra.mxu1 %v2626_v26 }
 0x28e   :  { %1207 = vmatpush.msrb.mxu2 %v2539_v59  ;;  %1227 = vmatpush.msrb.mxu3 %v2542_v5 }
 0x28f   :  { %1133 = vmatpush.msra.mxu1 %v2631_v27 }
 0x290   :  { %1208 = vmatpush.msrb.mxu2 %v2546_v60  ;;  %1228 = vmatpush.msrb.mxu3 %v2549_v42 }
 0x291   :  { %1134 = vmatpush.msra.mxu1 %v2636_v28 }
 0x292   :  { %1209 = vmatpush.msrb.mxu2 %v2553_v61  ;;  %1229 = vmatpush.msrb.mxu3 %v2556_v3 }
 0x293   :  { %1135 = vmatpush.msra.mxu1 %v2641_v31 }
 0x294   :  { %1210 = vmatpush.msrb.mxu2 %v2560_v63  ;;  %1230 = vmatpush.msrb.mxu3 %v2645_v33 }
 0x295   :  { %1136 = vmatpush.msra.mxu1 %v2648_v36 }
 0x296   :  { %1211 = vmatpush.msrb.mxu2 %v2565_v53  ;;  %1231 = vmatpush.msrb.mxu3 %v2652_v37 }
 0x297   :  { %1137 = vmatpush.msra.mxu1 %v2655_v49 }
 0x298   :  { %1212 = vmatpush.msrb.mxu2 %v2570_v0  ;;  %1232 = vmatpush.msrb.mxu3 %v2659_v54 }
 0x299   :  { %1138 = vmatpush.msra.mxu1 %v2662_v50 }
 0x29a   :  { %1213 = vmatpush.msrb.mxu2 %v2575_v1  ;;  %1233 = vmatpush.msrb.mxu3 %v2666_v34 }
 0x29b   :  { %1139 = vmatpush.msra.mxu1 %v2669_v8 }
 0x29c   :  { %1214 = vmatpush.msrb.mxu2 %v2672_v11  ;;  %1234 = vmatpush.msrb.mxu3 %v2675_v18 }
 0x29d   :  { %1140 = vmatpush.msra.mxu1 %v2678_v6 }
 0x29e   :  { %1215 = vmatpush.msrb.mxu2 %v2681_v38  ;;  %1235 = vmatpush.msrb.mxu3 %v2684_v43 }
 0x29f   :  { %1141 = vmatpush.msra.mxu1 %v3018_v29  ;;  %v3034_v29 = vld [vmem:[#allocation31_spill] sm:$0xff] }
 0x2a0   :  { %1216 = vmatpush.msrb.mxu2 %v2688_v4  ;;  %1236 = vmatpush.msrb.mxu3 %v2691_v9 }
 0x2a1   :  { %1142 = vmatpush.msra.mxu1 %v3021_v35 }
 0x2a2   :  { %1217 = vmatpush.msrb.mxu2 %v2695_v15  ;;  %1237 = vmatpush.msrb.mxu3 %v2698_v52 }
 0x2ff   :  { %v874_v47 = vpop.f32.mrf.mxu1 }
 0x300   :  { %v917_v30 = vadd.f32 %v874_v47, %v3034_v29 }
 0x302   :  { %v1600_v45 = vmul.f32 -1.442695, %v917_v30 }
 0x304   :  { %1648 = vpow2.f32 %v1600_v45 }
 0x305   :  { %v894_v40 = vpop.f32.mrf.mxu2 }
 0x306   :  { %v918_v2 = vadd.f32 %v894_v40, %v3035_v41  ;;  %v914_v30 = vpop.f32.mrf.mxu3 }
 0x308   :  { %v1601_v10 = vmul.f32 -1.442695, %v918_v2 }
 0x30a   :  { %v1649_v12 = vpop.eup %1648  ;;  %1650 = vpow2.f32 %v1601_v10 }
 0x30b   :  { %v925_v35 = vadd.f32 1.0, %v1649_v12 }
 0x30d   :  { %1652 = vrcp.f32 %v925_v35  ;;  %v938_v23 = vand.u32 2147483648, %v925_v35  ;;  %v936_v47 = vand.u32 2147483647, %v925_v35  ;;  %vm932_vm12 = vweird.f32 %v925_v35 }
 0x30f   :  { %v939_v40 = vor.u32 1.1754944e-38, %v938_v23  ;;  %vm937_vm14 = vcmp.eq.f32.partialorder %v936_v47, 8.507059e+37 }
 0x310   :  { %v1651_v44 = vpop.eup %1650 }
 0x311   :  { %v926_v48 = vadd.f32 1.0, %v1651_v44  ;;  %v957_v44 = vadd.f32 %v2418_v62, %v914_v30 }
 0x313   :  { %v1653_v57 = vpop.eup %1652  ;;  %1654 = vrcp.f32 %v926_v48  ;;  %v953_v43 = vand.u32 2147483648, %v926_v48  ;;  %vm947_vm0 = vweird.f32 %v926_v48  ;;  %v951_v38 = vand.u32 2147483647, %v926_v48 }
 0x314   :  { %v928_v39 = vmul.f32 %v1653_v57, %v925_v35  ;;  %vm933_vm11 = vweird.f32 %v1653_v57 }
 0x315   :  { %vm934_vm13 = vmor %vm932_vm12, %vm933_vm11  ;;  %v954_v23 = vor.u32 1.1754944e-38, %v953_v43  ;;  %vm952_vm3 = vcmp.eq.f32.partialorder %v951_v38, 8.507059e+37 }
 0x316   :  { %v929_v13 = vsub.f32 1.0, %v928_v39  ;;  %v3036_v39 = vld [vmem:[#allocation41_spill] sm:$0xff] }
 0x318   :  { %v930_v52 = vmul.f32 %v1653_v57, %v929_v13 }
 0x319   :  { %v1655_v29 = vpop.eup %1654 }
 0x31a   :  { %v943_v45 = vmul.f32 %v1655_v29, %v926_v48  ;;  %v931_v15 = vadd.f32 %v1653_v57, %v930_v52  ;;  %vm948_vm15 = vweird.f32 %v1655_v29  ;;  %v3037_v48 = vld [vmem:[#allocation10_spill] sm:$0xff] }
 0x31b   :  { %vm949_vm2 = vmor %vm947_vm0, %vm948_vm15 }
 0x31c   :  { %v944_v41 = vsub.f32 1.0, %v943_v45  ;;  %v935_v2 = vsel %vm934_vm13, %v1653_v57, %v931_v15 }
 0x31d   :  { %v940_v10 = vsel %vm937_vm14, %v939_v40, %v935_v2 }
 0x31e   :  { %v958_v12 = vmul.f32 %v957_v44, %v940_v10  ;;  %v945_v9 = vmul.f32 %v1655_v29, %v944_v41  ;;  %v3045_v10 = vld [vmem:[#allocation42_spill] sm:$0xff] }
 0x320   :  { %v959_v4 = vadd.f32 %v958_v12, %v3036_v39  ;;  %v946_v13 = vadd.f32 %v1655_v29, %v945_v9 }
 0x322   :  { %1656 = vtanh.f32 %v959_v4  ;;  %v950_v52 = vsel %vm949_vm2, %v1655_v29, %v946_v13 }
 0x323   :  { %v955_v15 = vsel %vm952_vm3, %v954_v23, %v950_v52 }
 0x328   :  { %v1657_v35 = vpop.eup %1656 }
 0x329   :  { %v961_v57 = vsub.f32 %v2596_v14, %v1657_v35 }
 0x32b   :  { %v962_v47 = vmul.f32 %v961_v57, %v955_v15 }
 0x32d   :  { %v2706_v30 = vadd.f32 %v1657_v35, %v962_v47 }
 0x32f   :  { %988 = vmatmul.f32.vlgmr.msrb.gmra.mxu0 %v2706_v30  ;;  %1008 = vmatmul.f32.vlgmr.msrb.gmra.mxu1 %v2706_v30 }
 0x330   :  { %1028 = vmatmul.f32.vlgmr.msra.gmra.mxu2 %v2706_v30  ;;  %1242 = vmatpush.msrb.mxu0 %v2601_v7 }
 0x331   :  { %1317 = vmatpush.msrb.mxu1 %v2504_v16  ;;  %1337 = vmatpush.msra.mxu2 %v2507_v46  ;;  %v3038_v16 = vld [vmem:[#allocation12_spill] sm:$0xff]  ;;  %v2753_v46 = vld [vmem:[#allocation4 + $0x28] sm:$0xff] }
 0x332   :  { %1243 = vmatpush.msrb.mxu0 %v2606_v19 }
 0x333   :  { %1318 = vmatpush.msrb.mxu1 %v2511_v24  ;;  %1338 = vmatpush.msra.mxu2 %v2514_v25  ;;  %v3039_v24 = vld [vmem:[#allocation23_spill] sm:$0xff] }
 0x334   :  { %1244 = vmatpush.msrb.mxu0 %v2611_v20  ;;  %v3040_v25 = vld [vmem:[#allocation11_spill] sm:$0xff] }
 0x335   :  { %1319 = vmatpush.msrb.mxu1 %v2518_v55  ;;  %1339 = vmatpush.msra.mxu2 %v2521_v32  ;;  %v2758_v55 = vld [vmem:[#allocation4 + $0x10] sm:$0xff]  ;;  %v3041_v32 = vld [vmem:[#allocation13_spill] sm:$0xff] }
 0x336   :  { %1245 = vmatpush.msrb.mxu0 %v2616_v21 }
 0x337   :  { %1320 = vmatpush.msrb.mxu1 %v2525_v56  ;;  %1340 = vmatpush.msra.mxu2 %v2528_v17  ;;  %v3042_v56 = vld [vmem:[#allocation24_spill] sm:$0xff] }
 0x338   :  { %1246 = vmatpush.msrb.mxu0 %v2621_v22 }
 0x339   :  { %1321 = vmatpush.msrb.mxu1 %v2532_v58  ;;  %1341 = vmatpush.msra.mxu2 %v2535_v51  ;;  %v3043_v51 = vld [vmem:[#allocation33_spill] sm:$0xff] }
 0x33a   :  { %1247 = vmatpush.msrb.mxu0 %v2626_v26 }
 0x33b   :  { %1322 = vmatpush.msrb.mxu1 %v2539_v59  ;;  %1342 = vmatpush.msra.mxu2 %v2542_v5  ;;  %v3044_v5 = vld [vmem:[#allocation34_spill] sm:$0xff] }
 0x33c   :  { %1248 = vmatpush.msrb.mxu0 %v2631_v27 }
 0x33d   :  { %1323 = vmatpush.msrb.mxu1 %v2546_v60  ;;  %1343 = vmatpush.msra.mxu2 %v2549_v42 }
 0x33e   :  { %1249 = vmatpush.msrb.mxu0 %v2636_v28 }
 0x33f   :  { %1324 = vmatpush.msrb.mxu1 %v2553_v61  ;;  %1344 = vmatpush.msra.mxu2 %v2556_v3 }
 0x340   :  { %1250 = vmatpush.msrb.mxu0 %v2641_v31 }
 0x341   :  { %1325 = vmatpush.msrb.mxu1 %v2560_v63  ;;  %1345 = vmatpush.msra.mxu2 %v2645_v33 }
 0x342   :  { %1251 = vmatpush.msrb.mxu0 %v2648_v36 }
 0x343   :  { %1326 = vmatpush.msrb.mxu1 %v2565_v53  ;;  %1346 = vmatpush.msra.mxu2 %v2652_v37 }
 0x344   :  { %1252 = vmatpush.msrb.mxu0 %v2655_v49 }
 0x345   :  { %1327 = vmatpush.msrb.mxu1 %v2570_v0  ;;  %1347 = vmatpush.msra.mxu2 %v2659_v54 }
 0x346   :  { %1253 = vmatpush.msrb.mxu0 %v2662_v50 }
 0x347   :  { %1328 = vmatpush.msrb.mxu1 %v2575_v1  ;;  %1348 = vmatpush.msra.mxu2 %v2666_v34 }
 0x348   :  { %1254 = vmatpush.msrb.mxu0 %v2669_v8 }
 0x349   :  { %1329 = vmatpush.msrb.mxu1 %v2672_v11  ;;  %1349 = vmatpush.msra.mxu2 %v2675_v18 }
 0x34a   :  { %1255 = vmatpush.msrb.mxu0 %v2678_v6 }
 0x34b   :  { %1330 = vmatpush.msrb.mxu1 %v3037_v48  ;;  %1350 = vmatpush.msra.mxu2 %v3038_v16  ;;  %v1444_v16 = vld [vmem:[%s2922_s7 + $0x48] sm:$0xff] }
 0x34c   :  { %1256 = vmatpush.msrb.mxu0 %v2753_v46 }
 0x34d   :  { %1331 = vmatpush.msrb.mxu1 %v3039_v24  ;;  %1351 = vmatpush.msra.mxu2 %v3040_v25  ;;  %v1442_v24 = vld [vmem:[%s2922_s7 + $0x38] sm:$0xff] }
 0x34e   :  { %1257 = vmatpush.msrb.mxu0 %v2758_v55 }
 0x34f   :  { %1332 = vmatpush.msrb.mxu1 %v3041_v32  ;;  %1352 = vmatpush.msra.mxu2 %v3042_v56 }
 0x3ac   :  { %v989_v17 = vpop.f32.mrf.mxu0  ;;  %v1009_v58 = vpop.f32.mrf.mxu1 }
 0x3ad   :  { %v1032_v59 = vadd.f32 %v989_v17, %v3043_v51  ;;  %v1033_v60 = vadd.f32 %v1009_v58, %v3044_v5  ;;  %v1440_v17 = vld [vmem:[%s2922_s7 + $0x28] sm:$0xff]  ;;  %v1439_v51 = vld [vmem:[%s2922_s7 + $0x20] sm:$0xff]  ;;  %v1437_v5 = vld [vmem:[%s2922_s7 + $0x10] sm:$0xff] }
 0x3af   :  { %v1602_v42 = vmul.f32 -1.442695, %v1032_v59  ;;  %v1603_v61 = vmul.f32 -1.442695, %v1033_v60  ;;  %v1438_v59 = vld [vmem:[%s2922_s7 + $0x18] sm:$0xff]  ;;  %v1436_v60 = vld [vmem:[%s2922_s7 + $0x8] sm:$0xff] }
 0x3b1   :  { %1658 = vpow2.f32 %v1602_v42 }
 0x3b2   :  { %1660 = vpow2.f32 %v1603_v61 }
 0x3b3   :  { %v1029_v43 = vpop.f32.mrf.mxu2 }
 0x3b4   :  { %v1072_v40 = vadd.f32 %v2418_v62, %v1029_v43 }
 0x3b7   :  { %v1659_v3 = vpop.eup %1658 }
 0x3b8   :  { %v1661_v63 = vpop.eup %1660  ;;  %v1040_v53 = vadd.f32 1.0, %v1659_v3 }
 0x3b9   :  { %v1041_v0 = vadd.f32 1.0, %v1661_v63  ;;  %v1435_v63 = vld [vmem:[%s2922_s7] sm:$0xff] }
 0x3ba   :  { %1662 = vrcp.f32 %v1040_v53  ;;  %v1053_v11 = vand.u32 2147483648, %v1040_v53  ;;  %v1051_v38 = vand.u32 2147483647, %v1040_v53  ;;  %vm1047_vm5 = vweird.f32 %v1040_v53 }
 0x3bb   :  { %1664 = vrcp.f32 %v1041_v0  ;;  %v1068_v13 = vand.u32 2147483648, %v1041_v0  ;;  %vm1062_vm9 = vweird.f32 %v1041_v0  ;;  %v1066_v52 = vand.u32 2147483647, %v1041_v0 }
 0x3bc   :  { %v1054_v29 = vor.u32 1.1754944e-38, %v1053_v11  ;;  %vm1052_vm7 = vcmp.eq.f32.partialorder %v1051_v38, 8.507059e+37  ;;  %v2842_v38 = vld [vmem:[%s2921_s6] ss:$0 sm:$0xff] }
 0x3bd   :  { %v1069_v57 = vor.u32 1.1754944e-38, %v1068_v13  ;;  %vm1067_vm11 = vcmp.eq.f32.partialorder %v1066_v52, 8.507059e+37 }
 0x3c0   :  { %v1663_v1 = vpop.eup %1662 }
 0x3c1   :  { %v1665_v33 = vpop.eup %1664  ;;  %v1043_v37 = vmul.f32 %v1663_v1, %v1040_v53  ;;  %vm1048_vm4 = vweird.f32 %v1663_v1 }
 0x3c2   :  { %v1058_v34 = vmul.f32 %v1665_v33, %v1041_v0  ;;  %vm1049_vm6 = vmor %vm1047_vm5, %vm1048_vm4  ;;  %vm1063_vm8 = vweird.f32 %v1665_v33 }
 0x3c3   :  { %v1044_v54 = vsub.f32 1.0, %v1043_v37  ;;  %vm1064_vm10 = vmor %vm1062_vm9, %vm1063_vm8 }
 0x3c4   :  { %v1059_v9 = vsub.f32 1.0, %v1058_v34 }
 0x3c5   :  { %v1045_v18 = vmul.f32 %v1663_v1, %v1044_v54 }
 0x3c6   :  { %v1060_v44 = vmul.f32 %v1665_v33, %v1059_v9 }
 0x3c7   :  { %v1046_v4 = vadd.f32 %v1663_v1, %v1045_v18 }
 0x3c8   :  { %v1061_v39 = vadd.f32 %v1665_v33, %v1060_v44 }
 0x3c9   :  { %v1050_v45 = vsel %vm1049_vm6, %v1663_v1, %v1046_v4 }
 0x3ca   :  { %v1055_v41 = vsel %vm1052_vm7, %v1054_v29, %v1050_v45  ;;  %v1065_v35 = vsel %vm1064_vm10, %v1665_v33, %v1061_v39 }
 0x3cb   :  { %v1073_v2 = vmul.f32 %v1072_v40, %v1055_v41  ;;  %v1070_v47 = vsel %vm1067_vm11, %v1069_v57, %v1065_v35  ;;  %v3048_v40 = vld [vmem:[#allocation43_spill] sm:$0xff] }
 0x3cd   :  { %v1074_v12 = vadd.f32 %v1073_v2, %v3045_v10 }
 0x3cf   :  { %1666 = vtanh.f32 %v1074_v12 }
 0x3d5   :  { %v1667_v23 = vpop.eup %1666 }
 0x3d6   :  { %v1076_v15 = vsub.f32 %v2706_v30, %v1667_v23 }
 0x3d8   :  { %v1077_v62 = vmul.f32 %v1076_v15, %v1070_v47  ;;  %v3049_v15 = vld [vmem:[#allocation45_spill] sm:$0xff]  ;;  %v3050_v47 = vld [vmem:[#allocation22_spill] sm:$0xff] }
 0x3da   :  { %v2768_v48 = vadd.f32 %v1667_v23, %v1077_v62 }
 0x3dc   :  { %1103 = vmatmul.f32.vlgmr.msra.gmra.mxu3 %v2768_v48  ;;  %1123 = vmatmul.f32.vlgmr.msra.gmra.mxu0 %v2768_v48 }
 0x3dd   :  { %1143 = vmatmul.f32.vlgmr.msra.gmra.mxu1 %v2768_v48  ;;  %1357 = vmatpush.msra.mxu3 %v2601_v7  ;;  %v1450_v7 = vld [vmem:[%s2922_s7 + $0x78] sm:$0xff] }
 0x3de   :  { %1455 = vmatpush.msra.mxu0 %v1450_v7 }
 0x3df   :  { %1358 = vmatpush.msra.mxu3 %v2606_v19 }
 0x3e1   :  { %1359 = vmatpush.msra.mxu3 %v2611_v20  ;;  %v3046_v20 = vld [vmem:[#allocation36_spill] sm:$0xff] }
 0x3e3   :  { %1360 = vmatpush.msra.mxu3 %v2616_v21 }
 0x3e5   :  { %1361 = vmatpush.msra.mxu3 %v2621_v22  ;;  %v1449_v22 = vld [vmem:[%s2922_s7 + $0x70] sm:$0xff] }
 0x3e6   :  { %1456 = vmatpush.msra.mxu0 %v1449_v22 }
 0x3e7   :  { %1362 = vmatpush.msra.mxu3 %v2626_v26  ;;  %v1448_v26 = vld [vmem:[%s2922_s7 + $0x68] sm:$0xff] }
 0x3e8   :  { %1457 = vmatpush.msra.mxu0 %v1448_v26  ;;  %v3052_v26 = vld [vmem:[#allocation38_spill] sm:$0xff] }
 0x3e9   :  { %1363 = vmatpush.msra.mxu3 %v2631_v27 }
 0x3eb   :  { %1364 = vmatpush.msra.mxu3 %v2636_v28  ;;  %v1447_v28 = vld [vmem:[%s2922_s7 + $0x60] sm:$0xff] }
 0x3ec   :  { %1458 = vmatpush.msra.mxu0 %v1447_v28 }
 0x3ed   :  { %1365 = vmatpush.msra.mxu3 %v2641_v31  ;;  %v1446_v31 = vld [vmem:[%s2922_s7 + $0x58] sm:$0xff] }
 0x3ee   :  { %1459 = vmatpush.msra.mxu0 %v1446_v31 }
 0x3ef   :  { %1366 = vmatpush.msra.mxu3 %v2648_v36 }
 0x3f1   :  { %1367 = vmatpush.msra.mxu3 %v2655_v49  ;;  %v3047_v49 = vld [vmem:[#allocation35_spill] sm:$0xff] }
 0x3f3   :  { %1368 = vmatpush.msra.mxu3 %v2662_v50 }
 0x3f5   :  { %1369 = vmatpush.msra.mxu3 %v2669_v8  ;;  %v1445_v8 = vld [vmem:[%s2922_s7 + $0x50] sm:$0xff] }
 0x3f6   :  { %1460 = vmatpush.msra.mxu0 %v1445_v8 }
 0x3f7   :  { %1370 = vmatpush.msra.mxu3 %v2678_v6 }
 0x3f8   :  { %1461 = vmatpush.msra.mxu0 %v1444_v16 }
 0x3f9   :  { %1371 = vmatpush.msra.mxu3 %v2753_v46  ;;  %v1443_v46 = vld [vmem:[%s2922_s7 + $0x40] sm:$0xff] }
 0x3fa   :  { %1462 = vmatpush.msra.mxu0 %v1443_v46 }
 0x3fb   :  { %1372 = vmatpush.msra.mxu3 %v2758_v55  ;;  %v1441_v55 = vld [vmem:[%s2922_s7 + $0x30] sm:$0xff] }
 0x3fc   :  { %1463 = vmatpush.msra.mxu0 %v1442_v24 }
 0x3fe   :  { %1464 = vmatpush.msra.mxu0 %v1441_v55 }
 0x400   :  { %1465 = vmatpush.msra.mxu0 %v1440_v17 }
 0x402   :  { %1466 = vmatpush.msra.mxu0 %v1439_v51 }
 0x404   :  { %1467 = vmatpush.msra.mxu0 %v1438_v59 }
 0x406   :  { %1468 = vmatpush.msra.mxu0 %v1437_v5 }
 0x408   :  { %1469 = vmatpush.msra.mxu0 %v1436_v60 }
 0x40a   :  { %1470 = vmatpush.msra.mxu0 %v1435_v63 }
 0x459   :  { %v1124_v19 = vpop.f32.mrf.mxu0 }
 0x45a   :  { %v1148_v21 = vadd.f32 %v1124_v19, %v3046_v20  ;;  %v1144_v54 = vpop.f32.mrf.mxu1  ;;  %v2861_v20 = vld [vmem:[%s2923_s8] ss:$0 sm:$0xff] }
 0x45b   :  { %v1187_v43 = vadd.f32 %v2842_v38, %v1144_v54 }
 0x45c   :  { %v1605_v27 = vmul.f32 -1.442695, %v1148_v21  ;;  %v3051_v21 = vld [vmem:[#allocation37_spill] sm:$0xff] }
 0x45e   :  { %1668 = vpow2.f32 %v1605_v27 }
 0x45f   :  { %v1104_v36 = vpop.f32.mrf.mxu3 }
 0x460   :  { %v1147_v50 = vadd.f32 %v1104_v36, %v3047_v49 }
 0x462   :  { %v1604_v6 = vmul.f32 -1.442695, %v1147_v50 }
 0x464   :  { %1670 = vpow2.f32 %v1604_v6  ;;  %v1669_v25 = vpop.eup %1668 }
 0x465   :  { %v1156_v56 = vadd.f32 1.0, %v1669_v25 }
 0x467   :  { %v1183_v44 = vand.u32 2147483648, %v1156_v56  ;;  %vm1177_vm2 = vweird.f32 %v1156_v56  ;;  %v1181_v10 = vand.u32 2147483647, %v1156_v56 }
 0x469   :  { %v1184_v13 = vor.u32 1.1754944e-38, %v1183_v44  ;;  %vm1182_vm4 = vcmp.eq.f32.partialorder %v1181_v10, 8.507059e+37 }
 0x46a   :  { %v1671_v32 = vpop.eup %1670 }
 0x46b   :  { %v1155_v58 = vadd.f32 1.0, %v1671_v32 }
 0x46d   :  { %1672 = vrcp.f32 %v1155_v58  ;;  %v1168_v1 = vand.u32 2147483648, %v1155_v58  ;;  %v1166_v37 = vand.u32 2147483647, %v1155_v58  ;;  %vm1162_vm13 = vweird.f32 %v1155_v58 }
 0x46e   :  { %1674 = vrcp.f32 %v1156_v56 }
 0x46f   :  { %v1169_v18 = vor.u32 1.1754944e-38, %v1168_v1  ;;  %vm1167_vm15 = vcmp.eq.f32.partialorder %v1166_v37, 8.507059e+37 }
 0x473   :  { %v1673_v42 = vpop.eup %1672 }
 0x474   :  { %v1675_v61 = vpop.eup %1674  ;;  %v1158_v3 = vmul.f32 %v1673_v42, %v1155_v58  ;;  %vm1163_vm12 = vweird.f32 %v1673_v42 }
 0x475   :  { %v1173_v0 = vmul.f32 %v1675_v61, %v1156_v56  ;;  %vm1164_vm14 = vmor %vm1162_vm13, %vm1163_vm12  ;;  %vm1178_vm0 = vweird.f32 %v1675_v61 }
 0x476   :  { %v1159_v53 = vsub.f32 1.0, %v1158_v3  ;;  %vm1179_vm3 = vmor %vm1177_vm2, %vm1178_vm0 }
 0x477   :  { %v1174_v11 = vsub.f32 1.0, %v1173_v0 }
 0x478   :  { %v1160_v33 = vmul.f32 %v1673_v42, %v1159_v53 }
 0x479   :  { %v1175_v45 = vmul.f32 %v1675_v61, %v1174_v11 }
 0x47a   :  { %v1161_v34 = vadd.f32 %v1673_v42, %v1160_v33 }
 0x47b   :  { %v1176_v2 = vadd.f32 %v1675_v61, %v1175_v45 }
 0x47c   :  { %v1165_v4 = vsel %vm1164_vm14, %v1673_v42, %v1161_v34  ;;  %v3053_v34 = vld [vmem:[#allocation44_spill] sm:$0xff] }
 0x47d   :  { %v1170_v9 = vsel %vm1167_vm15, %v1169_v18, %v1165_v4  ;;  %v1180_v12 = vsel %vm1179_vm3, %v1675_v61, %v1176_v2 }
 0x47e   :  { %v1188_v29 = vmul.f32 %v1187_v43, %v1170_v9  ;;  %v1185_v35 = vsel %vm1182_vm4, %v1184_v13, %v1180_v12 }
 0x480   :  { %v1189_v41 = vadd.f32 %v1188_v29, %v3048_v40 }
 0x482   :  { %1676 = vtanh.f32 %v1189_v41 }
 0x488   :  { %v1677_v39 = vpop.eup %1676 }
 0x489   :  { %v1191_v52 = vsub.f32 %v2768_v48, %v1677_v39 }
 0x48b   :  { %v1192_v23 = vmul.f32 %v1191_v52, %v1185_v35 }
 0x48d   :  { %v2847_v57 = vadd.f32 %v1677_v39, %v1192_v23 }
 0x48f   :  { %1218 = vmatmul.f32.vlgmr.msrb.gmra.mxu2 %v2847_v57  ;;  %1238 = vmatmul.f32.vlgmr.msrb.gmra.mxu3 %v2847_v57 }
 0x490   :  { %1258 = vmatmul.f32.vlgmr.msrb.gmra.mxu0 %v2847_v57 }
 0x498   :  { %1471 = vmatmul.f32.vlgmr.msra.gmra.mxu0 %v3049_v15  ;;  %v3054_v15 = vld [vmem:[#allocation39_spill] sm:$0xff] }
 0x4a0   :  { %1474 = vmatmul.f32.gmra.mxu0 %v3050_v47 }
 0x4a8   :  { %1477 = vmatmul.f32.gmra.mxu0 %v2596_v14 }
 0x4b0   :  { %1480 = vmatmul.f32.gmra.mxu0 %v2706_v30 }
 0x4b8   :  { %1483 = vmatmul.f32.gmra.mxu0 %v2768_v48 }
 0x4c0   :  { %1486 = vmatmul.f32.gmra.mxu0 %v2847_v57 }
 0x50d   :  { %v1259_v62 = vpop.f32.mrf.mxu0 }
 0x50e   :  { %v1302_v0 = vadd.f32 %v2842_v38, %v1259_v62 }
 0x512   :  { %v1219_v7 = vpop.f32.mrf.mxu2  ;;  %v1239_v19 = vpop.f32.mrf.mxu3 }
 0x513   :  { %v1262_v22 = vadd.f32 %v1219_v7, %v3051_v21  ;;  %v1263_v27 = vadd.f32 %v1239_v19, %v3052_v26 }
 0x515   :  { %v1606_v28 = vmul.f32 -1.442695, %v1262_v22  ;;  %v1607_v14 = vmul.f32 -1.442695, %v1263_v27  ;;  %v1472_v31 = vpop.f32.mrf.mxu0  ;;  %v3055_v22 = vld [vmem:[#allocation40_spill] sm:$0xff] }
 0x516   :  { %v1473_v30 = vadd.f32 %v2861_v20, %v1472_v31 }
 0x517   :  { %1678 = vpow2.f32 %v1606_v28 }
 0x518   :  { %1680 = vpow2.f32 %v1607_v14 }
 0x519   :  { %1682 = vtanh.f32 %v1473_v30 }
 0x51d   :  { %v1679_v48 = vpop.eup %1678  ;;  %v1475_v36 = vpop.f32.mrf.mxu0 }
 0x51e   :  { %v1681_v49 = vpop.eup %1680  ;;  %v1270_v50 = vadd.f32 1.0, %v1679_v48  ;;  %v1476_v8 = vadd.f32 %v2861_v20, %v1475_v36 }
 0x51f   :  { %v1683_v6 = vpop.eup %1682  ;;  %v1271_v16 = vadd.f32 1.0, %v1681_v49 }
 0x520   :  { %1684 = vrcp.f32 %v1270_v50  ;;  %1504 = vst.msk [vmem:[%s2925_s10] sm:$0xff] %vm82_vm1, %v1683_v6  ;;  %v1283_v58 = vand.u32 2147483648, %v1270_v50  ;;  %v1281_v5 = vand.u32 2147483647, %v1270_v50  ;;  %vm1277_vm6 = vweird.f32 %v1270_v50 }
 0x521   :  { %1686 = vrcp.f32 %v1271_v16  ;;  %v1298_v29 = vand.u32 2147483648, %v1271_v16  ;;  %vm1292_vm10 = vweird.f32 %v1271_v16  ;;  %v1296_v45 = vand.u32 2147483647, %v1271_v16 }
 0x522   :  { %1688 = vtanh.f32 %v1476_v8  ;;  %v1284_v3 = vor.u32 1.1754944e-38, %v1283_v58  ;;  %vm1282_vm8 = vcmp.eq.f32.partialorder %v1281_v5, 8.507059e+37 }
 0x523   :  { %v1299_v2 = vor.u32 1.1754944e-38, %v1298_v29  ;;  %vm1297_vm12 = vcmp.eq.f32.partialorder %v1296_v45, 8.507059e+37 }
 0x525   :  { %v1478_v46 = vpop.f32.mrf.mxu0 }
 0x526   :  { %v1685_v24 = vpop.eup %1684  ;;  %v1479_v25 = vadd.f32 %v2861_v20, %v1478_v46 }
 0x527   :  { %v1687_v55 = vpop.eup %1686  ;;  %v1273_v32 = vmul.f32 %v1685_v24, %v1270_v50  ;;  %vm1278_vm5 = vweird.f32 %v1685_v24 }
 0x528   :  { %v1689_v56 = vpop.eup %1688  ;;  %1690 = vtanh.f32 %v1479_v25  ;;  %v1288_v51 = vmul.f32 %v1687_v55, %v1271_v16  ;;  %vm1279_vm7 = vmor %vm1277_vm6, %vm1278_vm5  ;;  %vm1293_vm9 = vweird.f32 %v1687_v55 }
 0x529   :  { %v1274_v17 = vsub.f32 1.0, %v1273_v32  ;;  %1505 = vst.msk [vmem:[%s2925_s10 + $0x8] sm:$0xff] %vm82_vm1, %v1689_v56  ;;  %vm1294_vm11 = vmor %vm1292_vm10, %vm1293_vm9 }
 0x52a   :  { %v1289_v63 = vsub.f32 1.0, %v1288_v51 }
 0x52b   :  { %v1275_v59 = vmul.f32 %v1685_v24, %v1274_v17 }
 0x52c   :  { %v1290_v54 = vmul.f32 %v1687_v55, %v1289_v63 }
 0x52d   :  { %v1276_v60 = vadd.f32 %v1685_v24, %v1275_v59  ;;  %v1481_v42 = vpop.f32.mrf.mxu0 }
 0x52e   :  { %v1691_v61 = vpop.eup %1690  ;;  %v1482_v53 = vadd.f32 %v2861_v20, %v1481_v42  ;;  %v1291_v4 = vadd.f32 %v1687_v55, %v1290_v54 }
 0x52f   :  { %v1280_v1 = vsel %vm1279_vm7, %v1685_v24, %v1276_v60  ;;  %1506 = vst.msk [vmem:[%s2925_s10 + $0x10] sm:$0xff] %vm82_vm1, %v1691_v61  ;;  %v3056_v60 = vld [vmem:[#allocation46_spill] sm:$0xff] }
 0x530   :  { %v1285_v33 = vsel %vm1282_vm8, %v1284_v3, %v1280_v1  ;;  %1692 = vtanh.f32 %v1482_v53  ;;  %v1295_v40 = vsel %vm1294_vm11, %v1687_v55, %v1291_v4 }
 0x531   :  { %v1303_v37 = vmul.f32 %v1302_v0, %v1285_v33  ;;  %v1300_v12 = vsel %vm1297_vm12, %v1299_v2, %v1295_v40 }
 0x533   :  { %v1304_v11 = vadd.f32 %v1303_v37, %v3053_v34 }
 0x535   :  { %v1484_v18 = vpop.f32.mrf.mxu0  ;;  %1694 = vtanh.f32 %v1304_v11 }
 0x536   :  { %v1693_v43 = vpop.eup %1692  ;;  %v1485_v9 = vadd.f32 %v2861_v20, %v1484_v18 }
 0x537   :  { %1507 = vst.msk [vmem:[%s2925_s10 + $0x18] sm:$0xff] %vm82_vm1, %v1693_v43 }
 0x538   :  { %1696 = vtanh.f32 %v1485_v9 }
 0x53b   :  { %v1695_v41 = vpop.eup %1694 }
 0x53c   :  { %v1306_v44 = vsub.f32 %v2847_v57, %v1695_v41 }
 0x53d   :  { %v1487_v10 = vpop.f32.mrf.mxu0 }
 0x53e   :  { %v1697_v39 = vpop.eup %1696  ;;  %v1488_v13 = vadd.f32 %v2861_v20, %v1487_v10  ;;  %v1307_v52 = vmul.f32 %v1306_v44, %v1300_v12 }
 0x53f   :  { %1508 = vst.msk [vmem:[%s2925_s10 + $0x20] sm:$0xff] %vm82_vm1, %v1697_v39 }
 0x540   :  { %1698 = vtanh.f32 %v1488_v13  ;;  %v1308_v35 = vadd.f32 %v1695_v41, %v1307_v52 }
 0x542   :  { %1333 = vmatmul.f32.vlgmr.msrb.gmra.mxu1 %v1308_v35  ;;  %1353 = vmatmul.f32.vlgmr.msra.gmra.mxu2 %v1308_v35 }
 0x543   :  { %1373 = vmatmul.f32.vlgmr.msra.gmra.mxu3 %v1308_v35  ;;  %1489 = vmatmul.f32.gmra.mxu0 %v1308_v35 }
 0x546   :  { %v1699_v23 = vpop.eup %1698 }
 0x547   :  { %1509 = vst.msk [vmem:[%s2925_s10 + $0x28] sm:$0xff] %vm82_vm1, %v1699_v23 }
 0x5bf   :  { %v1334_v57 = vpop.f32.mrf.mxu1 }
 0x5c0   :  { %v1377_v47 = vadd.f32 %v1334_v57, %v3054_v15  ;;  %v1490_v62 = vpop.f32.mrf.mxu0 }
 0x5c1   :  { %v1491_v7 = vadd.f32 %v2861_v20, %v1490_v62 }
 0x5c2   :  { %v1608_v19 = vmul.f32 -1.442695, %v1377_v47 }
 0x5c3   :  { %1700 = vtanh.f32 %v1491_v7 }
 0x5c4   :  { %1702 = vpow2.f32 %v1608_v19 }
 0x5c5   :  { %v1354_v21 = vpop.f32.mrf.mxu2 }
 0x5c6   :  { %v1378_v26 = vadd.f32 %v1354_v21, %v3055_v22  ;;  %v1374_v24 = vpop.f32.mrf.mxu3 }
 0x5c7   :  { %v1417_v17 = vadd.f32 %v2842_v38, %v1374_v24 }
 0x5c8   :  { %v1609_v27 = vmul.f32 -1.442695, %v1378_v26 }
 0x5c9   :  { %v1701_v28 = vpop.eup %1700 }
 0x5ca   :  { %v1703_v14 = vpop.eup %1702  ;;  %1510 = vst.msk [vmem:[%s2925_s10 + $0x30] sm:$0xff] %vm82_vm1, %v1701_v28  ;;  %1704 = vpow2.f32 %v1609_v27 }
 0x5cb   :  { %v1385_v31 = vadd.f32 1.0, %v1703_v14 }
 0x5cd   :  { %1706 = vrcp.f32 %v1385_v31  ;;  %v1398_v8 = vand.u32 2147483648, %v1385_v31  ;;  %v1396_v16 = vand.u32 2147483647, %v1385_v31  ;;  %vm1392_vm14 = vweird.f32 %v1385_v31 }
 0x5cf   :  { %v1399_v32 = vor.u32 1.1754944e-38, %v1398_v8  ;;  %vm1397_vm0 = vcmp.eq.f32.partialorder %v1396_v16, 8.507059e+37 }
 0x5d0   :  { %v1705_v30 = vpop.eup %1704 }
 0x5d1   :  { %v1386_v48 = vadd.f32 1.0, %v1705_v30 }
 0x5d3   :  { %v1707_v36 = vpop.eup %1706  ;;  %1708 = vrcp.f32 %v1386_v48  ;;  %v1413_v3 = vand.u32 2147483648, %v1386_v48  ;;  %vm1407_vm3 = vweird.f32 %v1386_v48  ;;  %v1411_v63 = vand.u32 2147483647, %v1386_v48 }
 0x5d4   :  { %v1388_v49 = vmul.f32 %v1707_v36, %v1385_v31  ;;  %vm1393_vm13 = vweird.f32 %v1707_v36 }
 0x5d5   :  { %vm1394_vm15 = vmor %vm1392_vm14, %vm1393_vm13  ;;  %v1414_v1 = vor.u32 1.1754944e-38, %v1413_v3  ;;  %vm1412_vm5 = vcmp.eq.f32.partialorder %v1411_v63, 8.507059e+37 }
 0x5d6   :  { %v1389_v50 = vsub.f32 1.0, %v1388_v49 }
 0x5d8   :  { %v1390_v6 = vmul.f32 %v1707_v36, %v1389_v50 }
 0x5d9   :  { %v1709_v46 = vpop.eup %1708 }
 0x5da   :  { %v1391_v25 = vadd.f32 %v1707_v36, %v1390_v6  ;;  %v1403_v55 = vmul.f32 %v1709_v46, %v1386_v48  ;;  %vm1408_vm2 = vweird.f32 %v1709_v46 }
 0x5db   :  { %vm1409_vm4 = vmor %vm1407_vm3, %vm1408_vm2 }
 0x5dc   :  { %v1395_v56 = vsel %vm1394_vm15, %v1707_v36, %v1391_v25  ;;  %v1404_v58 = vsub.f32 1.0, %v1403_v55 }
 0x5dd   :  { %v1400_v51 = vsel %vm1397_vm0, %v1399_v32, %v1395_v56 }
 0x5de   :  { %v1418_v59 = vmul.f32 %v1417_v17, %v1400_v51  ;;  %v1405_v5 = vmul.f32 %v1709_v46, %v1404_v58 }
 0x5e0   :  { %v1419_v42 = vadd.f32 %v1418_v59, %v3056_v60  ;;  %v1406_v61 = vadd.f32 %v1709_v46, %v1405_v5 }
 0x5e2   :  { %1710 = vtanh.f32 %v1419_v42  ;;  %v1410_v53 = vsel %vm1409_vm4, %v1709_v46, %v1406_v61 }
 0x5e3   :  { %v1415_v37 = vsel %vm1412_vm5, %v1414_v1, %v1410_v53 }
 0x5e8   :  { %v1711_v0 = vpop.eup %1710 }
 0x5e9   :  { %v1421_v33 = vsub.f32 %v1308_v35, %v1711_v0 }
 0x5eb   :  { %v1422_v38 = vmul.f32 %v1421_v33, %v1415_v37 }
 0x5ed   :  { %v1423_v54 = vadd.f32 %v1711_v0, %v1422_v38 }
 0x5ef   :  { %1492 = vmatmul.f32.gmra.mxu0 %v1423_v54  ;;  %1426 = vst [vmem:[#allocation7] sm:$0xff] %v1423_v54 }
 0x5f0   :  { %1524 = dma.vmem_to_hbm [thread:$0]  %s1520_s21, 128, %s1522_s20, [#allocation6]  }
 0x66c   :  { %v1493_v34 = vpop.f32.mrf.mxu0 }
 0x66d   :  { %v1494_v11 = vadd.f32 %v2861_v20, %v1493_v34 }
 0x66f   :  { %1712 = vtanh.f32 %v1494_v11 }
 0x675   :  { %v1713_v18 = vpop.eup %1712 }
 0x676   :  { %1511 = vst.msk [vmem:[%s2925_s10 + $0x38] sm:$0xff] %vm82_vm1, %v1713_v18 }
 0x677   :  { %1813 = dma.done.wait [#allocation6], 128  }
 0x678   :  { %1814 = vsyncadd [#allocation6], 4294967168 }
 0x679   :  { %1531 = vsyncpa [#allocation5], 1 }
 0x67a   :  { %1532 = vsyncpa [#allocation6], 1 }

</bundles_post_ra>
